<compile_context>
chip_gen: v7x
topology: tpu7x:2x2x1
jax: 0.10.0
libtpu: 0.0.40
codegen_flags: <defaults>
</compile_context>

<pallas_src>
import functools

import jax
import jax.numpy as jnp
from jax import lax
from jax.experimental import pallas as pl
from jax.experimental.pallas import tpu as pltpu


# ----------------------------------------------------------------------------
# Fused kernel: all LSTM layers + output Linear, single invocation.
# Gate order inside the packed 4H dimension is [i, f, o, g] (wrapper-reordered).
# ----------------------------------------------------------------------------
def _fused_lstm_kernel(num_layers, S, Bp, H, matmul_dtype, *refs):
    # refs = inputs..., outputs..., scratch
    # inputs : x2d, h0, c0, [w_ih_t, w_hh_t, b] * num_layers, w_lin_t, b_lin
    # outputs: out2d, h_n, c_n
    # scratch: ys (S*Bp, H) layer-output buffer
    n_in = 3 + 3 * num_layers + 2
    x_ref, h0_ref, c0_ref = refs[0], refs[1], refs[2]
    layer_refs = refs[3:3 + 3 * num_layers]
    w_lin_ref, b_lin_ref = refs[3 + 3 * num_layers:n_in]
    out_ref, hn_ref, cn_ref = refs[n_in], refs[n_in + 1], refs[n_in + 2]
    ys_ref = refs[n_in + 3]

    def mm(a, b):
        # MXU matmul; operands optionally cast (bf16 on v6e/v7x), f32 accum.
        return jnp.dot(a.astype(matmul_dtype), b.astype(matmul_dtype),
                       preferred_element_type=jnp.float32)

    y = x_ref[...]                                   # (S*Bp, in_dim)
    for l in range(num_layers):
        wih = layer_refs[3 * l][...]                 # (in_dim, 4H)
        whh = layer_refs[3 * l + 1][...]             # (H, 4H)
        b = layer_refs[3 * l + 2][...]               # (1, 4H)

        # Hoisted input projection: one big matmul for all timesteps.
        gx = mm(y, wih) + b                          # (S*Bp, 4H) f32

        h = h0_ref[l]                                # (Bp, H)
        c = c0_ref[l]                                # (Bp, H)
        for t in range(S):                           # fully unrolled recurrence
            r0 = t * Bp                              # static, sublane-aligned
            gates = gx[r0:r0 + Bp, :] + mm(h, whh)   # (Bp, 4H)
            # Gate order [i, f, o, g]: one transcendental pass for the three
            # sigmoid gates (via tanh identity), one for the tanh gate.
            sg = jnp.tanh(0.5 * gates[:, :3 * H]) * 0.5 + 0.5
            g_g = jnp.tanh(gates[:, 3 * H:4 * H])
            i_g = sg[:, 0:H]
            f_g = sg[:, H:2 * H]
            o_g = sg[:, 2 * H:3 * H]
            c = f_g * c + i_g * g_g
            h = o_g * jnp.tanh(c)
            ys_ref[r0:r0 + Bp, :] = h                # aligned scratch store
        hn_ref[l] = h
        cn_ref[l] = c
        y = ys_ref[...]                              # (S*Bp, H) next-layer input

    # Output Linear on the flattened sequence, single writeback.
    out_ref[...] = mm(y, w_lin_ref[...]) + b_lin_ref[...]


def model_forward(params, inp, hidden, matmul_dtype=jnp.float32):
    """inp: (S, B, input_size); hidden = (h0, c0), each (num_layers, B, H).

    Returns (output (S, B, input_size), (h_n, c_n)) — same semantics as the
    PyTorch Model.forward (nn.LSTM + nn.Linear), inference mode.
    """
    h0, c0 = hidden
    S, B, I = inp.shape
    L, _, H = h0.shape

    # Pad batch to the 8-sublane width so all in-kernel slabs are vreg-aligned.
    Bp = max(8, ((B + 7) // 8) * 8)

    def pad_b(a, axis):
        if Bp == B:
            return a
        pad = [(0, 0)] * a.ndim
        pad[axis] = (0, Bp - B)
        return jnp.pad(a, pad)

    x_p = pad_b(inp, 1).reshape(S * Bp, I)
    h0_p = pad_b(h0, 1)
    c0_p = pad_b(c0, 1)

    flat_args = [x_p, h0_p, c0_p]
    for p in params["layers"]:
        flat_args += [p["w_ih_t"], p["w_hh_t"], p["b"]]
    flat_args += [params["linear_w_t"], params["linear_b"]]

    kernel = functools.partial(_fused_lstm_kernel, L, S, Bp, H, matmul_dtype)
    out2d, h_n, c_n = pl.pallas_call(
        kernel,
        out_shape=(jax.ShapeDtypeStruct((S * Bp, I), jnp.float32),
                   jax.ShapeDtypeStruct((L, Bp, H), jnp.float32),
                   jax.ShapeDtypeStruct((L, Bp, H), jnp.float32)),
        scratch_shapes=[pltpu.VMEM((S * Bp, H), jnp.float32)],
        compiler_params=pltpu.CompilerParams(
            vmem_limit_bytes=32 * 1024 * 1024),
    )(*flat_args)

    out = out2d.reshape(S, Bp, I)[:, :B, :]
    return out, (h_n[:, :B, :], c_n[:, :B, :])


# ----------------------------------------------------------------------------
# Parameter init mimicking nn.LSTM / nn.Linear (uniform +/- 1/sqrt(H)), with
# forget-gate biases set to 1.0 as in Model.init_states().  Gate blocks are
# reordered from PyTorch's [i, f, g, o] to [i, f, o, g] (pure repacking; the
# computed function is identical).
# ----------------------------------------------------------------------------
def _reorder_ifgo_to_ifog(w, hidden_size):
    H = hidden_size
    return jnp.concatenate([w[0:2 * H], w[3 * H:4 * H], w[2 * H:3 * H]], axis=0)


def init_params(key, input_size, hidden_size, num_layers):
    bound = 1.0 / jnp.sqrt(jnp.float32(hidden_size))
    params = {"layers": []}
    for layer in range(num_layers):
        in_dim = input_size if layer == 0 else hidden_size
        key, k1, k2, k3, k4 = jax.random.split(key, 5)
        w_ih = jax.random.uniform(k1, (4 * hidden_size, in_dim), jnp.float32,
                                  -bound, bound)
        w_hh = jax.random.uniform(k2, (4 * hidden_size, hidden_size),
                                  jnp.float32, -bound, bound)
        b_ih = jax.random.uniform(k3, (4 * hidden_size,), jnp.float32,
                                  -bound, bound)
        b_hh = jax.random.uniform(k4, (4 * hidden_size,), jnp.float32,
                                  -bound, bound)
        # init_states(): forget-gate bias slice [H:2H] <- 1.0 for b_ih and b_hh
        b_ih = b_ih.at[hidden_size:2 * hidden_size].set(1.0)
        b_hh = b_hh.at[hidden_size:2 * hidden_size].set(1.0)
        w_ih_r = _reorder_ifgo_to_ifog(w_ih, hidden_size)
        w_hh_r = _reorder_ifgo_to_ifog(w_hh, hidden_size)
        b_r = _reorder_ifgo_to_ifog(b_ih + b_hh, hidden_size)
        params["layers"].append(
            dict(w_ih_t=w_ih_r.T, w_hh_t=w_hh_r.T,
                 b=b_r.reshape(1, 4 * hidden_size)))
    key, k5, k6 = jax.random.split(key, 3)
    lin_bound = 1.0 / jnp.sqrt(jnp.float32(hidden_size))
    w_lin = jax.random.uniform(k5, (input_size, hidden_size), jnp.float32,
                               -lin_bound, lin_bound)
    b_lin = jax.random.uniform(k6, (input_size,), jnp.float32,
                               -lin_bound, lin_bound)
    params["linear_w_t"] = w_lin.T
    params["linear_b"] = b_lin.reshape(1, input_size)
    return params


# ----------------------------------------------------------------------------
# Pure-JAX reference (for correctness check).  Uses the same [i, f, o, g]
# packed layout as stored in params.
# ----------------------------------------------------------------------------
def reference_forward(params, inp, hidden):
    h0, c0 = hidden
    x = inp
    hs, cs = [], []
    for layer, p in enumerate(params["layers"]):
        def step(carry, x_t, p=p):
            h, c = carry
            gates = x_t @ p["w_ih_t"] + h @ p["w_hh_t"] + p["b"]
            H = h.shape[-1]
            i = jax.nn.sigmoid(gates[:, 0:H])
            f = jax.nn.sigmoid(gates[:, H:2 * H])
            o = jax.nn.sigmoid(gates[:, 2 * H:3 * H])
            g = jnp.tanh(gates[:, 3 * H:4 * H])
            c = f * c + i * g
            h = o * jnp.tanh(c)
            return (h, c), h
        (h_n, c_n), x = lax.scan(step, (h0[layer], c0[layer]), x)
        hs.append(h_n)
        cs.append(c_n)
    out = x @ params["linear_w_t"] + params["linear_b"]
    return out, (jnp.stack(hs), jnp.stack(cs))


if __name__ == "__main__":
    input_size, hidden_size, num_layers = 16, 32, 2
    seq_len, batch = 8, 2

    key = jax.random.PRNGKey(0)
    kp, kx = jax.random.split(key)
    params = init_params(kp, input_size, hidden_size, num_layers)

    inp = jax.random.normal(kx, (seq_len, batch, input_size), jnp.float32)
    hidden = (jnp.zeros((num_layers, batch, hidden_size), jnp.float32),
              jnp.zeros((num_layers, batch, hidden_size), jnp.float32))

    out, (h_n, c_n) = model_forward(params, inp, hidden)
    out = jax.block_until_ready(out)
    h_n = jax.block_until_ready(h_n)
    c_n = jax.block_until_ready(c_n)

    ref_out, (ref_h, ref_c) = reference_forward(params, inp, hidden)
    assert out.shape == (seq_len, batch, input_size)
    assert h_n.shape == (num_layers, batch, hidden_size)
    assert c_n.shape == (num_layers, batch, hidden_size)
    assert jnp.allclose(out, ref_out, atol=1e-3, rtol=1e-3)
    assert jnp.allclose(h_n, ref_h, atol=1e-3, rtol=1e-3)
    assert jnp.allclose(c_n, ref_c, atol=1e-3, rtol=1e-3)

    print("KERNEL_OK")
</pallas_src>

<mosaic_0001>
module attributes {stable_mosaic.version = 11 : i64} {
  func.func @_fused_lstm_kernel(%arg0: memref<64x16xf32, #tpu.memory_space<vmem>>, %arg1: memref<2x8x32xf32, #tpu.memory_space<vmem>>, %arg2: memref<2x8x32xf32, #tpu.memory_space<vmem>>, %arg3: memref<16x128xf32, #tpu.memory_space<vmem>>, %arg4: memref<32x128xf32, #tpu.memory_space<vmem>>, %arg5: memref<1x128xf32, #tpu.memory_space<vmem>>, %arg6: memref<32x128xf32, #tpu.memory_space<vmem>>, %arg7: memref<32x128xf32, #tpu.memory_space<vmem>>, %arg8: memref<1x128xf32, #tpu.memory_space<vmem>>, %arg9: memref<32x16xf32, #tpu.memory_space<vmem>>, %arg10: memref<1x16xf32, #tpu.memory_space<vmem>>, %arg11: memref<64x16xf32, #tpu.memory_space<vmem>>, %arg12: memref<2x8x32xf32, #tpu.memory_space<vmem>>, %arg13: memref<2x8x32xf32, #tpu.memory_space<vmem>>, %arg14: memref<64x32xf32, #tpu.memory_space<vmem>>) attributes {dimension_semantics = [], scalar_prefetch = 0 : i64, scratch_operands = 1 : i64, tpu.core_type = #tpu.core_type<tc>} {
    %c0 = arith.constant 0 : index
    %c0_0 = arith.constant 0 : index
    %0 = vector.load %arg0[%c0, %c0_0] : memref<64x16xf32, #tpu.memory_space<vmem>>, vector<64x16xf32>
    %c0_1 = arith.constant 0 : index
    %c0_2 = arith.constant 0 : index
    %1 = vector.load %arg3[%c0_1, %c0_2] : memref<16x128xf32, #tpu.memory_space<vmem>>, vector<16x128xf32>
    %c0_3 = arith.constant 0 : index
    %c0_4 = arith.constant 0 : index
    %2 = vector.load %arg4[%c0_3, %c0_4] : memref<32x128xf32, #tpu.memory_space<vmem>>, vector<32x128xf32>
    %c0_5 = arith.constant 0 : index
    %c0_6 = arith.constant 0 : index
    %3 = vector.load %arg5[%c0_5, %c0_6] : memref<1x128xf32, #tpu.memory_space<vmem>>, vector<1x128xf32>
    %cst = arith.constant dense<0.000000e+00> : vector<64x128xf32>
    %4 = tpu.matmul %0, %1, %cst {dimension_numbers = #tpu.dot_dimension_numbers<[1], [0], [0], [1], [0, 0, 1, 1], [], []>} : vector<64x16xf32>, vector<16x128xf32>, vector<64x128xf32> -> vector<64x128xf32>
    %5 = vector.broadcast %3 : vector<1x128xf32> to vector<64x128xf32>
    %6 = arith.addf %4, %5 : vector<64x128xf32>
    %c0_7 = arith.constant 0 : index
    %c0_8 = arith.constant 0 : index
    %c0_9 = arith.constant 0 : index
    %7 = vector.load %arg1[%c0_7, %c0_8, %c0_9] : memref<2x8x32xf32, #tpu.memory_space<vmem>>, vector<1x8x32xf32>
    %8 = vector.shape_cast %7 : vector<1x8x32xf32> to vector<8x32xf32>
    %c0_10 = arith.constant 0 : index
    %c0_11 = arith.constant 0 : index
    %c0_12 = arith.constant 0 : index
    %9 = vector.load %arg2[%c0_10, %c0_11, %c0_12] : memref<2x8x32xf32, #tpu.memory_space<vmem>>, vector<1x8x32xf32>
    %10 = vector.shape_cast %9 : vector<1x8x32xf32> to vector<8x32xf32>
    %11 = vector.extract_strided_slice %6 {offsets = [0, 0], sizes = [8, 128], strides = [1, 1]} : vector<64x128xf32> to vector<8x128xf32>
    %cst_13 = arith.constant dense<0.000000e+00> : vector<8x128xf32>
    %12 = tpu.matmul %8, %2, %cst_13 {dimension_numbers = #tpu.dot_dimension_numbers<[1], [0], [0], [1], [0, 0, 1, 1], [], []>} : vector<8x32xf32>, vector<32x128xf32>, vector<8x128xf32> -> vector<8x128xf32>
    %13 = arith.addf %11, %12 : vector<8x128xf32>
    %14 = vector.extract_strided_slice %13 {offsets = [0, 0], sizes = [8, 96], strides = [1, 1]} : vector<8x128xf32> to vector<8x96xf32>
    %cst_14 = arith.constant 5.000000e-01 : f32
    %15 = vector.broadcast %cst_14 : f32 to vector<8x96xf32>
    %16 = arith.mulf %15, %14 : vector<8x96xf32>
    %17 = math.tanh %16 : vector<8x96xf32>
    %cst_15 = arith.constant 5.000000e-01 : f32
    %18 = vector.broadcast %cst_15 : f32 to vector<8x96xf32>
    %19 = arith.mulf %17, %18 : vector<8x96xf32>
    %cst_16 = arith.constant 5.000000e-01 : f32
    %20 = vector.broadcast %cst_16 : f32 to vector<8x96xf32>
    %21 = arith.addf %19, %20 : vector<8x96xf32>
    %22 = vector.extract_strided_slice %13 {offsets = [0, 96], sizes = [8, 32], strides = [1, 1]} : vector<8x128xf32> to vector<8x32xf32>
    %23 = math.tanh %22 : vector<8x32xf32>
    %24 = vector.extract_strided_slice %21 {offsets = [0, 0], sizes = [8, 32], strides = [1, 1]} : vector<8x96xf32> to vector<8x32xf32>
    %25 = vector.extract_strided_slice %21 {offsets = [0, 32], sizes = [8, 32], strides = [1, 1]} : vector<8x96xf32> to vector<8x32xf32>
    %26 = vector.extract_strided_slice %21 {offsets = [0, 64], sizes = [8, 32], strides = [1, 1]} : vector<8x96xf32> to vector<8x32xf32>
    %27 = arith.mulf %25, %10 : vector<8x32xf32>
    %28 = arith.mulf %24, %23 : vector<8x32xf32>
    %29 = arith.addf %27, %28 : vector<8x32xf32>
    %30 = math.tanh %29 : vector<8x32xf32>
    %31 = arith.mulf %26, %30 : vector<8x32xf32>
    %c0_17 = arith.constant 0 : index
    %c0_18 = arith.constant 0 : index
    %32 = vector.load %arg14[%c0_17, %c0_18] : memref<64x32xf32, #tpu.memory_space<vmem>>, vector<8x32xf32>
    tpu.vector_store %arg14[%c0_17, %c0_18], %31 {strides = array<i32>} : memref<64x32xf32, #tpu.memory_space<vmem>>, vector<8x32xf32>,
    %33 = vector.extract_strided_slice %6 {offsets = [8, 0], sizes = [8, 128], strides = [1, 1]} : vector<64x128xf32> to vector<8x128xf32>
    %cst_19 = arith.constant dense<0.000000e+00> : vector<8x128xf32>
    %34 = tpu.matmul %31, %2, %cst_19 {dimension_numbers = #tpu.dot_dimension_numbers<[1], [0], [0], [1], [0, 0, 1, 1], [], []>} : vector<8x32xf32>, vector<32x128xf32>, vector<8x128xf32> -> vector<8x128xf32>
    %35 = arith.addf %33, %34 : vector<8x128xf32>
    %36 = vector.extract_strided_slice %35 {offsets = [0, 0], sizes = [8, 96], strides = [1, 1]} : vector<8x128xf32> to vector<8x96xf32>
    %cst_20 = arith.constant 5.000000e-01 : f32
    %37 = vector.broadcast %cst_20 : f32 to vector<8x96xf32>
    %38 = arith.mulf %37, %36 : vector<8x96xf32>
    %39 = math.tanh %38 : vector<8x96xf32>
    %cst_21 = arith.constant 5.000000e-01 : f32
    %40 = vector.broadcast %cst_21 : f32 to vector<8x96xf32>
    %41 = arith.mulf %39, %40 : vector<8x96xf32>
    %cst_22 = arith.constant 5.000000e-01 : f32
    %42 = vector.broadcast %cst_22 : f32 to vector<8x96xf32>
    %43 = arith.addf %41, %42 : vector<8x96xf32>
    %44 = vector.extract_strided_slice %35 {offsets = [0, 96], sizes = [8, 32], strides = [1, 1]} : vector<8x128xf32> to vector<8x32xf32>
    %45 = math.tanh %44 : vector<8x32xf32>
    %46 = vector.extract_strided_slice %43 {offsets = [0, 0], sizes = [8, 32], strides = [1, 1]} : vector<8x96xf32> to vector<8x32xf32>
    %47 = vector.extract_strided_slice %43 {offsets = [0, 32], sizes = [8, 32], strides = [1, 1]} : vector<8x96xf32> to vector<8x32xf32>
    %48 = vector.extract_strided_slice %43 {offsets = [0, 64], sizes = [8, 32], strides = [1, 1]} : vector<8x96xf32> to vector<8x32xf32>
    %49 = arith.mulf %47, %29 : vector<8x32xf32>
    %50 = arith.mulf %46, %45 : vector<8x32xf32>
    %51 = arith.addf %49, %50 : vector<8x32xf32>
    %52 = math.tanh %51 : vector<8x32xf32>
    %53 = arith.mulf %48, %52 : vector<8x32xf32>
    %c8 = arith.constant 8 : index
    %c0_23 = arith.constant 0 : index
    %54 = vector.load %arg14[%c8, %c0_23] : memref<64x32xf32, #tpu.memory_space<vmem>>, vector<8x32xf32>
    tpu.vector_store %arg14[%c8, %c0_23], %53 {strides = array<i32>} : memref<64x32xf32, #tpu.memory_space<vmem>>, vector<8x32xf32>,
    %55 = vector.extract_strided_slice %6 {offsets = [16, 0], sizes = [8, 128], strides = [1, 1]} : vector<64x128xf32> to vector<8x128xf32>
    %cst_24 = arith.constant dense<0.000000e+00> : vector<8x128xf32>
    %56 = tpu.matmul %53, %2, %cst_24 {dimension_numbers = #tpu.dot_dimension_numbers<[1], [0], [0], [1], [0, 0, 1, 1], [], []>} : vector<8x32xf32>, vector<32x128xf32>, vector<8x128xf32> -> vector<8x128xf32>
    %57 = arith.addf %55, %56 : vector<8x128xf32>
    %58 = vector.extract_strided_slice %57 {offsets = [0, 0], sizes = [8, 96], strides = [1, 1]} : vector<8x128xf32> to vector<8x96xf32>
    %cst_25 = arith.constant 5.000000e-01 : f32
    %59 = vector.broadcast %cst_25 : f32 to vector<8x96xf32>
    %60 = arith.mulf %59, %58 : vector<8x96xf32>
    %61 = math.tanh %60 : vector<8x96xf32>
    %cst_26 = arith.constant 5.000000e-01 : f32
    %62 = vector.broadcast %cst_26 : f32 to vector<8x96xf32>
    %63 = arith.mulf %61, %62 : vector<8x96xf32>
    %cst_27 = arith.constant 5.000000e-01 : f32
    %64 = vector.broadcast %cst_27 : f32 to vector<8x96xf32>
    %65 = arith.addf %63, %64 : vector<8x96xf32>
    %66 = vector.extract_strided_slice %57 {offsets = [0, 96], sizes = [8, 32], strides = [1, 1]} : vector<8x128xf32> to vector<8x32xf32>
    %67 = math.tanh %66 : vector<8x32xf32>
    %68 = vector.extract_strided_slice %65 {offsets = [0, 0], sizes = [8, 32], strides = [1, 1]} : vector<8x96xf32> to vector<8x32xf32>
    %69 = vector.extract_strided_slice %65 {offsets = [0, 32], sizes = [8, 32], strides = [1, 1]} : vector<8x96xf32> to vector<8x32xf32>
    %70 = vector.extract_strided_slice %65 {offsets = [0, 64], sizes = [8, 32], strides = [1, 1]} : vector<8x96xf32> to vector<8x32xf32>
    %71 = arith.mulf %69, %51 : vector<8x32xf32>
    %72 = arith.mulf %68, %67 : vector<8x32xf32>
    %73 = arith.addf %71, %72 : vector<8x32xf32>
    %74 = math.tanh %73 : vector<8x32xf32>
    %75 = arith.mulf %70, %74 : vector<8x32xf32>
    %c16 = arith.constant 16 : index
    %c0_28 = arith.constant 0 : index
    %76 = vector.load %arg14[%c16, %c0_28] : memref<64x32xf32, #tpu.memory_space<vmem>>, vector<8x32xf32>
    tpu.vector_store %arg14[%c16, %c0_28], %75 {strides = array<i32>} : memref<64x32xf32, #tpu.memory_space<vmem>>, vector<8x32xf32>,
    %77 = vector.extract_strided_slice %6 {offsets = [24, 0], sizes = [8, 128], strides = [1, 1]} : vector<64x128xf32> to vector<8x128xf32>
    %cst_29 = arith.constant dense<0.000000e+00> : vector<8x128xf32>
    %78 = tpu.matmul %75, %2, %cst_29 {dimension_numbers = #tpu.dot_dimension_numbers<[1], [0], [0], [1], [0, 0, 1, 1], [], []>} : vector<8x32xf32>, vector<32x128xf32>, vector<8x128xf32> -> vector<8x128xf32>
    %79 = arith.addf %77, %78 : vector<8x128xf32>
    %80 = vector.extract_strided_slice %79 {offsets = [0, 0], sizes = [8, 96], strides = [1, 1]} : vector<8x128xf32> to vector<8x96xf32>
    %cst_30 = arith.constant 5.000000e-01 : f32
    %81 = vector.broadcast %cst_30 : f32 to vector<8x96xf32>
    %82 = arith.mulf %81, %80 : vector<8x96xf32>
    %83 = math.tanh %82 : vector<8x96xf32>
    %cst_31 = arith.constant 5.000000e-01 : f32
    %84 = vector.broadcast %cst_31 : f32 to vector<8x96xf32>
    %85 = arith.mulf %83, %84 : vector<8x96xf32>
    %cst_32 = arith.constant 5.000000e-01 : f32
    %86 = vector.broadcast %cst_32 : f32 to vector<8x96xf32>
    %87 = arith.addf %85, %86 : vector<8x96xf32>
    %88 = vector.extract_strided_slice %79 {offsets = [0, 96], sizes = [8, 32], strides = [1, 1]} : vector<8x128xf32> to vector<8x32xf32>
    %89 = math.tanh %88 : vector<8x32xf32>
    %90 = vector.extract_strided_slice %87 {offsets = [0, 0], sizes = [8, 32], strides = [1, 1]} : vector<8x96xf32> to vector<8x32xf32>
    %91 = vector.extract_strided_slice %87 {offsets = [0, 32], sizes = [8, 32], strides = [1, 1]} : vector<8x96xf32> to vector<8x32xf32>
    %92 = vector.extract_strided_slice %87 {offsets = [0, 64], sizes = [8, 32], strides = [1, 1]} : vector<8x96xf32> to vector<8x32xf32>
    %93 = arith.mulf %91, %73 : vector<8x32xf32>
    %94 = arith.mulf %90, %89 : vector<8x32xf32>
    %95 = arith.addf %93, %94 : vector<8x32xf32>
    %96 = math.tanh %95 : vector<8x32xf32>
    %97 = arith.mulf %92, %96 : vector<8x32xf32>
    %c24 = arith.constant 24 : index
    %c0_33 = arith.constant 0 : index
    %98 = vector.load %arg14[%c24, %c0_33] : memref<64x32xf32, #tpu.memory_space<vmem>>, vector<8x32xf32>
    tpu.vector_store %arg14[%c24, %c0_33], %97 {strides = array<i32>} : memref<64x32xf32, #tpu.memory_space<vmem>>, vector<8x32xf32>,
    %99 = vector.extract_strided_slice %6 {offsets = [32, 0], sizes = [8, 128], strides = [1, 1]} : vector<64x128xf32> to vector<8x128xf32>
    %cst_34 = arith.constant dense<0.000000e+00> : vector<8x128xf32>
    %100 = tpu.matmul %97, %2, %cst_34 {dimension_numbers = #tpu.dot_dimension_numbers<[1], [0], [0], [1], [0, 0, 1, 1], [], []>} : vector<8x32xf32>, vector<32x128xf32>, vector<8x128xf32> -> vector<8x128xf32>
    %101 = arith.addf %99, %100 : vector<8x128xf32>
    %102 = vector.extract_strided_slice %101 {offsets = [0, 0], sizes = [8, 96], strides = [1, 1]} : vector<8x128xf32> to vector<8x96xf32>
    %cst_35 = arith.constant 5.000000e-01 : f32
    %103 = vector.broadcast %cst_35 : f32 to vector<8x96xf32>
    %104 = arith.mulf %103, %102 : vector<8x96xf32>
    %105 = math.tanh %104 : vector<8x96xf32>
    %cst_36 = arith.constant 5.000000e-01 : f32
    %106 = vector.broadcast %cst_36 : f32 to vector<8x96xf32>
    %107 = arith.mulf %105, %106 : vector<8x96xf32>
    %cst_37 = arith.constant 5.000000e-01 : f32
    %108 = vector.broadcast %cst_37 : f32 to vector<8x96xf32>
    %109 = arith.addf %107, %108 : vector<8x96xf32>
    %110 = vector.extract_strided_slice %101 {offsets = [0, 96], sizes = [8, 32], strides = [1, 1]} : vector<8x128xf32> to vector<8x32xf32>
    %111 = math.tanh %110 : vector<8x32xf32>
    %112 = vector.extract_strided_slice %109 {offsets = [0, 0], sizes = [8, 32], strides = [1, 1]} : vector<8x96xf32> to vector<8x32xf32>
    %113 = vector.extract_strided_slice %109 {offsets = [0, 32], sizes = [8, 32], strides = [1, 1]} : vector<8x96xf32> to vector<8x32xf32>
    %114 = vector.extract_strided_slice %109 {offsets = [0, 64], sizes = [8, 32], strides = [1, 1]} : vector<8x96xf32> to vector<8x32xf32>
    %115 = arith.mulf %113, %95 : vector<8x32xf32>
    %116 = arith.mulf %112, %111 : vector<8x32xf32>
    %117 = arith.addf %115, %116 : vector<8x32xf32>
    %118 = math.tanh %117 : vector<8x32xf32>
    %119 = arith.mulf %114, %118 : vector<8x32xf32>
    %c32 = arith.constant 32 : index
    %c0_38 = arith.constant 0 : index
    %120 = vector.load %arg14[%c32, %c0_38] : memref<64x32xf32, #tpu.memory_space<vmem>>, vector<8x32xf32>
    tpu.vector_store %arg14[%c32, %c0_38], %119 {strides = array<i32>} : memref<64x32xf32, #tpu.memory_space<vmem>>, vector<8x32xf32>,
    %121 = vector.extract_strided_slice %6 {offsets = [40, 0], sizes = [8, 128], strides = [1, 1]} : vector<64x128xf32> to vector<8x128xf32>
    %cst_39 = arith.constant dense<0.000000e+00> : vector<8x128xf32>
    %122 = tpu.matmul %119, %2, %cst_39 {dimension_numbers = #tpu.dot_dimension_numbers<[1], [0], [0], [1], [0, 0, 1, 1], [], []>} : vector<8x32xf32>, vector<32x128xf32>, vector<8x128xf32> -> vector<8x128xf32>
    %123 = arith.addf %121, %122 : vector<8x128xf32>
    %124 = vector.extract_strided_slice %123 {offsets = [0, 0], sizes = [8, 96], strides = [1, 1]} : vector<8x128xf32> to vector<8x96xf32>
    %cst_40 = arith.constant 5.000000e-01 : f32
    %125 = vector.broadcast %cst_40 : f32 to vector<8x96xf32>
    %126 = arith.mulf %125, %124 : vector<8x96xf32>
    %127 = math.tanh %126 : vector<8x96xf32>
    %cst_41 = arith.constant 5.000000e-01 : f32
    %128 = vector.broadcast %cst_41 : f32 to vector<8x96xf32>
    %129 = arith.mulf %127, %128 : vector<8x96xf32>
    %cst_42 = arith.constant 5.000000e-01 : f32
    %130 = vector.broadcast %cst_42 : f32 to vector<8x96xf32>
    %131 = arith.addf %129, %130 : vector<8x96xf32>
    %132 = vector.extract_strided_slice %123 {offsets = [0, 96], sizes = [8, 32], strides = [1, 1]} : vector<8x128xf32> to vector<8x32xf32>
    %133 = math.tanh %132 : vector<8x32xf32>
    %134 = vector.extract_strided_slice %131 {offsets = [0, 0], sizes = [8, 32], strides = [1, 1]} : vector<8x96xf32> to vector<8x32xf32>
    %135 = vector.extract_strided_slice %131 {offsets = [0, 32], sizes = [8, 32], strides = [1, 1]} : vector<8x96xf32> to vector<8x32xf32>
    %136 = vector.extract_strided_slice %131 {offsets = [0, 64], sizes = [8, 32], strides = [1, 1]} : vector<8x96xf32> to vector<8x32xf32>
    %137 = arith.mulf %135, %117 : vector<8x32xf32>
    %138 = arith.mulf %134, %133 : vector<8x32xf32>
    %139 = arith.addf %137, %138 : vector<8x32xf32>
    %140 = math.tanh %139 : vector<8x32xf32>
    %141 = arith.mulf %136, %140 : vector<8x32xf32>
    %c40 = arith.constant 40 : index
    %c0_43 = arith.constant 0 : index
    %142 = vector.load %arg14[%c40, %c0_43] : memref<64x32xf32, #tpu.memory_space<vmem>>, vector<8x32xf32>
    tpu.vector_store %arg14[%c40, %c0_43], %141 {strides = array<i32>} : memref<64x32xf32, #tpu.memory_space<vmem>>, vector<8x32xf32>,
    %143 = vector.extract_strided_slice %6 {offsets = [48, 0], sizes = [8, 128], strides = [1, 1]} : vector<64x128xf32> to vector<8x128xf32>
    %cst_44 = arith.constant dense<0.000000e+00> : vector<8x128xf32>
    %144 = tpu.matmul %141, %2, %cst_44 {dimension_numbers = #tpu.dot_dimension_numbers<[1], [0], [0], [1], [0, 0, 1, 1], [], []>} : vector<8x32xf32>, vector<32x128xf32>, vector<8x128xf32> -> vector<8x128xf32>
    %145 = arith.addf %143, %144 : vector<8x128xf32>
    %146 = vector.extract_strided_slice %145 {offsets = [0, 0], sizes = [8, 96], strides = [1, 1]} : vector<8x128xf32> to vector<8x96xf32>
    %cst_45 = arith.constant 5.000000e-01 : f32
    %147 = vector.broadcast %cst_45 : f32 to vector<8x96xf32>
    %148 = arith.mulf %147, %146 : vector<8x96xf32>
    %149 = math.tanh %148 : vector<8x96xf32>
    %cst_46 = arith.constant 5.000000e-01 : f32
    %150 = vector.broadcast %cst_46 : f32 to vector<8x96xf32>
    %151 = arith.mulf %149, %150 : vector<8x96xf32>
    %cst_47 = arith.constant 5.000000e-01 : f32
    %152 = vector.broadcast %cst_47 : f32 to vector<8x96xf32>
    %153 = arith.addf %151, %152 : vector<8x96xf32>
    %154 = vector.extract_strided_slice %145 {offsets = [0, 96], sizes = [8, 32], strides = [1, 1]} : vector<8x128xf32> to vector<8x32xf32>
    %155 = math.tanh %154 : vector<8x32xf32>
    %156 = vector.extract_strided_slice %153 {offsets = [0, 0], sizes = [8, 32], strides = [1, 1]} : vector<8x96xf32> to vector<8x32xf32>
    %157 = vector.extract_strided_slice %153 {offsets = [0, 32], sizes = [8, 32], strides = [1, 1]} : vector<8x96xf32> to vector<8x32xf32>
    %158 = vector.extract_strided_slice %153 {offsets = [0, 64], sizes = [8, 32], strides = [1, 1]} : vector<8x96xf32> to vector<8x32xf32>
    %159 = arith.mulf %157, %139 : vector<8x32xf32>
    %160 = arith.mulf %156, %155 : vector<8x32xf32>
    %161 = arith.addf %159, %160 : vector<8x32xf32>
    %162 = math.tanh %161 : vector<8x32xf32>
    %163 = arith.mulf %158, %162 : vector<8x32xf32>
    %c48 = arith.constant 48 : index
    %c0_48 = arith.constant 0 : index
    %164 = vector.load %arg14[%c48, %c0_48] : memref<64x32xf32, #tpu.memory_space<vmem>>, vector<8x32xf32>
    tpu.vector_store %arg14[%c48, %c0_48], %163 {strides = array<i32>} : memref<64x32xf32, #tpu.memory_space<vmem>>, vector<8x32xf32>,
    %165 = vector.extract_strided_slice %6 {offsets = [56, 0], sizes = [8, 128], strides = [1, 1]} : vector<64x128xf32> to vector<8x128xf32>
    %cst_49 = arith.constant dense<0.000000e+00> : vector<8x128xf32>
    %166 = tpu.matmul %163, %2, %cst_49 {dimension_numbers = #tpu.dot_dimension_numbers<[1], [0], [0], [1], [0, 0, 1, 1], [], []>} : vector<8x32xf32>, vector<32x128xf32>, vector<8x128xf32> -> vector<8x128xf32>
    %167 = arith.addf %165, %166 : vector<8x128xf32>
    %168 = vector.extract_strided_slice %167 {offsets = [0, 0], sizes = [8, 96], strides = [1, 1]} : vector<8x128xf32> to vector<8x96xf32>
    %cst_50 = arith.constant 5.000000e-01 : f32
    %169 = vector.broadcast %cst_50 : f32 to vector<8x96xf32>
    %170 = arith.mulf %169, %168 : vector<8x96xf32>
    %171 = math.tanh %170 : vector<8x96xf32>
    %cst_51 = arith.constant 5.000000e-01 : f32
    %172 = vector.broadcast %cst_51 : f32 to vector<8x96xf32>
    %173 = arith.mulf %171, %172 : vector<8x96xf32>
    %cst_52 = arith.constant 5.000000e-01 : f32
    %174 = vector.broadcast %cst_52 : f32 to vector<8x96xf32>
    %175 = arith.addf %173, %174 : vector<8x96xf32>
    %176 = vector.extract_strided_slice %167 {offsets = [0, 96], sizes = [8, 32], strides = [1, 1]} : vector<8x128xf32> to vector<8x32xf32>
    %177 = math.tanh %176 : vector<8x32xf32>
    %178 = vector.extract_strided_slice %175 {offsets = [0, 0], sizes = [8, 32], strides = [1, 1]} : vector<8x96xf32> to vector<8x32xf32>
    %179 = vector.extract_strided_slice %175 {offsets = [0, 32], sizes = [8, 32], strides = [1, 1]} : vector<8x96xf32> to vector<8x32xf32>
    %180 = vector.extract_strided_slice %175 {offsets = [0, 64], sizes = [8, 32], strides = [1, 1]} : vector<8x96xf32> to vector<8x32xf32>
    %181 = arith.mulf %179, %161 : vector<8x32xf32>
    %182 = arith.mulf %178, %177 : vector<8x32xf32>
    %183 = arith.addf %181, %182 : vector<8x32xf32>
    %184 = math.tanh %183 : vector<8x32xf32>
    %185 = arith.mulf %180, %184 : vector<8x32xf32>
    %c56 = arith.constant 56 : index
    %c0_53 = arith.constant 0 : index
    %186 = vector.load %arg14[%c56, %c0_53] : memref<64x32xf32, #tpu.memory_space<vmem>>, vector<8x32xf32>
    tpu.vector_store %arg14[%c56, %c0_53], %185 {strides = array<i32>} : memref<64x32xf32, #tpu.memory_space<vmem>>, vector<8x32xf32>,
    %c0_54 = arith.constant 0 : index
    %c0_55 = arith.constant 0 : index
    %c0_56 = arith.constant 0 : index
    %187 = vector.load %arg12[%c0_54, %c0_55, %c0_56] : memref<2x8x32xf32, #tpu.memory_space<vmem>>, vector<1x8x32xf32>
    %188 = vector.shape_cast %187 : vector<1x8x32xf32> to vector<8x32xf32>
    %189 = vector.shape_cast %185 : vector<8x32xf32> to vector<1x8x32xf32>
    tpu.vector_store %arg12[%c0_54, %c0_55, %c0_56], %189 {strides = array<i32>} : memref<2x8x32xf32, #tpu.memory_space<vmem>>, vector<1x8x32xf32>,
    %c0_57 = arith.constant 0 : index
    %c0_58 = arith.constant 0 : index
    %c0_59 = arith.constant 0 : index
    %190 = vector.load %arg13[%c0_57, %c0_58, %c0_59] : memref<2x8x32xf32, #tpu.memory_space<vmem>>, vector<1x8x32xf32>
    %191 = vector.shape_cast %190 : vector<1x8x32xf32> to vector<8x32xf32>
    %192 = vector.shape_cast %183 : vector<8x32xf32> to vector<1x8x32xf32>
    tpu.vector_store %arg13[%c0_57, %c0_58, %c0_59], %192 {strides = array<i32>} : memref<2x8x32xf32, #tpu.memory_space<vmem>>, vector<1x8x32xf32>,
    %c0_60 = arith.constant 0 : index
    %c0_61 = arith.constant 0 : index
    %193 = vector.load %arg14[%c0_60, %c0_61] : memref<64x32xf32, #tpu.memory_space<vmem>>, vector<64x32xf32>
    %c0_62 = arith.constant 0 : index
    %c0_63 = arith.constant 0 : index
    %194 = vector.load %arg6[%c0_62, %c0_63] : memref<32x128xf32, #tpu.memory_space<vmem>>, vector<32x128xf32>
    %c0_64 = arith.constant 0 : index
    %c0_65 = arith.constant 0 : index
    %195 = vector.load %arg7[%c0_64, %c0_65] : memref<32x128xf32, #tpu.memory_space<vmem>>, vector<32x128xf32>
    %c0_66 = arith.constant 0 : index
    %c0_67 = arith.constant 0 : index
    %196 = vector.load %arg8[%c0_66, %c0_67] : memref<1x128xf32, #tpu.memory_space<vmem>>, vector<1x128xf32>
    %cst_68 = arith.constant dense<0.000000e+00> : vector<64x128xf32>
    %197 = tpu.matmul %193, %194, %cst_68 {dimension_numbers = #tpu.dot_dimension_numbers<[1], [0], [0], [1], [0, 0, 1, 1], [], []>} : vector<64x32xf32>, vector<32x128xf32>, vector<64x128xf32> -> vector<64x128xf32>
    %198 = vector.broadcast %196 : vector<1x128xf32> to vector<64x128xf32>
    %199 = arith.addf %197, %198 : vector<64x128xf32>
    %c1 = arith.constant 1 : index
    %c0_69 = arith.constant 0 : index
    %c0_70 = arith.constant 0 : index
    %200 = vector.load %arg1[%c1, %c0_69, %c0_70] : memref<2x8x32xf32, #tpu.memory_space<vmem>>, vector<1x8x32xf32>
    %201 = vector.shape_cast %200 : vector<1x8x32xf32> to vector<8x32xf32>
    %c1_71 = arith.constant 1 : index
    %c0_72 = arith.constant 0 : index
    %c0_73 = arith.constant 0 : index
    %202 = vector.load %arg2[%c1_71, %c0_72, %c0_73] : memref<2x8x32xf32, #tpu.memory_space<vmem>>, vector<1x8x32xf32>
    %203 = vector.shape_cast %202 : vector<1x8x32xf32> to vector<8x32xf32>
    %204 = vector.extract_strided_slice %199 {offsets = [0, 0], sizes = [8, 128], strides = [1, 1]} : vector<64x128xf32> to vector<8x128xf32>
    %cst_74 = arith.constant dense<0.000000e+00> : vector<8x128xf32>
    %205 = tpu.matmul %201, %195, %cst_74 {dimension_numbers = #tpu.dot_dimension_numbers<[1], [0], [0], [1], [0, 0, 1, 1], [], []>} : vector<8x32xf32>, vector<32x128xf32>, vector<8x128xf32> -> vector<8x128xf32>
    %206 = arith.addf %204, %205 : vector<8x128xf32>
    %207 = vector.extract_strided_slice %206 {offsets = [0, 0], sizes = [8, 96], strides = [1, 1]} : vector<8x128xf32> to vector<8x96xf32>
    %cst_75 = arith.constant 5.000000e-01 : f32
    %208 = vector.broadcast %cst_75 : f32 to vector<8x96xf32>
    %209 = arith.mulf %208, %207 : vector<8x96xf32>
    %210 = math.tanh %209 : vector<8x96xf32>
    %cst_76 = arith.constant 5.000000e-01 : f32
    %211 = vector.broadcast %cst_76 : f32 to vector<8x96xf32>
    %212 = arith.mulf %210, %211 : vector<8x96xf32>
    %cst_77 = arith.constant 5.000000e-01 : f32
    %213 = vector.broadcast %cst_77 : f32 to vector<8x96xf32>
    %214 = arith.addf %212, %213 : vector<8x96xf32>
    %215 = vector.extract_strided_slice %206 {offsets = [0, 96], sizes = [8, 32], strides = [1, 1]} : vector<8x128xf32> to vector<8x32xf32>
    %216 = math.tanh %215 : vector<8x32xf32>
    %217 = vector.extract_strided_slice %214 {offsets = [0, 0], sizes = [8, 32], strides = [1, 1]} : vector<8x96xf32> to vector<8x32xf32>
    %218 = vector.extract_strided_slice %214 {offsets = [0, 32], sizes = [8, 32], strides = [1, 1]} : vector<8x96xf32> to vector<8x32xf32>
    %219 = vector.extract_strided_slice %214 {offsets = [0, 64], sizes = [8, 32], strides = [1, 1]} : vector<8x96xf32> to vector<8x32xf32>
    %220 = arith.mulf %218, %203 : vector<8x32xf32>
    %221 = arith.mulf %217, %216 : vector<8x32xf32>
    %222 = arith.addf %220, %221 : vector<8x32xf32>
    %223 = math.tanh %222 : vector<8x32xf32>
    %224 = arith.mulf %219, %223 : vector<8x32xf32>
    %c0_78 = arith.constant 0 : index
    %c0_79 = arith.constant 0 : index
    %225 = vector.load %arg14[%c0_78, %c0_79] : memref<64x32xf32, #tpu.memory_space<vmem>>, vector<8x32xf32>
    tpu.vector_store %arg14[%c0_78, %c0_79], %224 {strides = array<i32>} : memref<64x32xf32, #tpu.memory_space<vmem>>, vector<8x32xf32>,
    %226 = vector.extract_strided_slice %199 {offsets = [8, 0], sizes = [8, 128], strides = [1, 1]} : vector<64x128xf32> to vector<8x128xf32>
    %cst_80 = arith.constant dense<0.000000e+00> : vector<8x128xf32>
    %227 = tpu.matmul %224, %195, %cst_80 {dimension_numbers = #tpu.dot_dimension_numbers<[1], [0], [0], [1], [0, 0, 1, 1], [], []>} : vector<8x32xf32>, vector<32x128xf32>, vector<8x128xf32> -> vector<8x128xf32>
    %228 = arith.addf %226, %227 : vector<8x128xf32>
    %229 = vector.extract_strided_slice %228 {offsets = [0, 0], sizes = [8, 96], strides = [1, 1]} : vector<8x128xf32> to vector<8x96xf32>
    %cst_81 = arith.constant 5.000000e-01 : f32
    %230 = vector.broadcast %cst_81 : f32 to vector<8x96xf32>
    %231 = arith.mulf %230, %229 : vector<8x96xf32>
    %232 = math.tanh %231 : vector<8x96xf32>
    %cst_82 = arith.constant 5.000000e-01 : f32
    %233 = vector.broadcast %cst_82 : f32 to vector<8x96xf32>
    %234 = arith.mulf %232, %233 : vector<8x96xf32>
    %cst_83 = arith.constant 5.000000e-01 : f32
    %235 = vector.broadcast %cst_83 : f32 to vector<8x96xf32>
    %236 = arith.addf %234, %235 : vector<8x96xf32>
    %237 = vector.extract_strided_slice %228 {offsets = [0, 96], sizes = [8, 32], strides = [1, 1]} : vector<8x128xf32> to vector<8x32xf32>
    %238 = math.tanh %237 : vector<8x32xf32>
    %239 = vector.extract_strided_slice %236 {offsets = [0, 0], sizes = [8, 32], strides = [1, 1]} : vector<8x96xf32> to vector<8x32xf32>
    %240 = vector.extract_strided_slice %236 {offsets = [0, 32], sizes = [8, 32], strides = [1, 1]} : vector<8x96xf32> to vector<8x32xf32>
    %241 = vector.extract_strided_slice %236 {offsets = [0, 64], sizes = [8, 32], strides = [1, 1]} : vector<8x96xf32> to vector<8x32xf32>
    %242 = arith.mulf %240, %222 : vector<8x32xf32>
    %243 = arith.mulf %239, %238 : vector<8x32xf32>
    %244 = arith.addf %242, %243 : vector<8x32xf32>
    %245 = math.tanh %244 : vector<8x32xf32>
    %246 = arith.mulf %241, %245 : vector<8x32xf32>
    %c8_84 = arith.constant 8 : index
    %c0_85 = arith.constant 0 : index
    %247 = vector.load %arg14[%c8_84, %c0_85] : memref<64x32xf32, #tpu.memory_space<vmem>>, vector<8x32xf32>
    tpu.vector_store %arg14[%c8_84, %c0_85], %246 {strides = array<i32>} : memref<64x32xf32, #tpu.memory_space<vmem>>, vector<8x32xf32>,
    %248 = vector.extract_strided_slice %199 {offsets = [16, 0], sizes = [8, 128], strides = [1, 1]} : vector<64x128xf32> to vector<8x128xf32>
    %cst_86 = arith.constant dense<0.000000e+00> : vector<8x128xf32>
    %249 = tpu.matmul %246, %195, %cst_86 {dimension_numbers = #tpu.dot_dimension_numbers<[1], [0], [0], [1], [0, 0, 1, 1], [], []>} : vector<8x32xf32>, vector<32x128xf32>, vector<8x128xf32> -> vector<8x128xf32>
    %250 = arith.addf %248, %249 : vector<8x128xf32>
    %251 = vector.extract_strided_slice %250 {offsets = [0, 0], sizes = [8, 96], strides = [1, 1]} : vector<8x128xf32> to vector<8x96xf32>
    %cst_87 = arith.constant 5.000000e-01 : f32
    %252 = vector.broadcast %cst_87 : f32 to vector<8x96xf32>
    %253 = arith.mulf %252, %251 : vector<8x96xf32>
    %254 = math.tanh %253 : vector<8x96xf32>
    %cst_88 = arith.constant 5.000000e-01 : f32
    %255 = vector.broadcast %cst_88 : f32 to vector<8x96xf32>
    %256 = arith.mulf %254, %255 : vector<8x96xf32>
    %cst_89 = arith.constant 5.000000e-01 : f32
    %257 = vector.broadcast %cst_89 : f32 to vector<8x96xf32>
    %258 = arith.addf %256, %257 : vector<8x96xf32>
    %259 = vector.extract_strided_slice %250 {offsets = [0, 96], sizes = [8, 32], strides = [1, 1]} : vector<8x128xf32> to vector<8x32xf32>
    %260 = math.tanh %259 : vector<8x32xf32>
    %261 = vector.extract_strided_slice %258 {offsets = [0, 0], sizes = [8, 32], strides = [1, 1]} : vector<8x96xf32> to vector<8x32xf32>
    %262 = vector.extract_strided_slice %258 {offsets = [0, 32], sizes = [8, 32], strides = [1, 1]} : vector<8x96xf32> to vector<8x32xf32>
    %263 = vector.extract_strided_slice %258 {offsets = [0, 64], sizes = [8, 32], strides = [1, 1]} : vector<8x96xf32> to vector<8x32xf32>
    %264 = arith.mulf %262, %244 : vector<8x32xf32>
    %265 = arith.mulf %261, %260 : vector<8x32xf32>
    %266 = arith.addf %264, %265 : vector<8x32xf32>
    %267 = math.tanh %266 : vector<8x32xf32>
    %268 = arith.mulf %263, %267 : vector<8x32xf32>
    %c16_90 = arith.constant 16 : index
    %c0_91 = arith.constant 0 : index
    %269 = vector.load %arg14[%c16_90, %c0_91] : memref<64x32xf32, #tpu.memory_space<vmem>>, vector<8x32xf32>
    tpu.vector_store %arg14[%c16_90, %c0_91], %268 {strides = array<i32>} : memref<64x32xf32, #tpu.memory_space<vmem>>, vector<8x32xf32>,
    %270 = vector.extract_strided_slice %199 {offsets = [24, 0], sizes = [8, 128], strides = [1, 1]} : vector<64x128xf32> to vector<8x128xf32>
    %cst_92 = arith.constant dense<0.000000e+00> : vector<8x128xf32>
    %271 = tpu.matmul %268, %195, %cst_92 {dimension_numbers = #tpu.dot_dimension_numbers<[1], [0], [0], [1], [0, 0, 1, 1], [], []>} : vector<8x32xf32>, vector<32x128xf32>, vector<8x128xf32> -> vector<8x128xf32>
    %272 = arith.addf %270, %271 : vector<8x128xf32>
    %273 = vector.extract_strided_slice %272 {offsets = [0, 0], sizes = [8, 96], strides = [1, 1]} : vector<8x128xf32> to vector<8x96xf32>
    %cst_93 = arith.constant 5.000000e-01 : f32
    %274 = vector.broadcast %cst_93 : f32 to vector<8x96xf32>
    %275 = arith.mulf %274, %273 : vector<8x96xf32>
    %276 = math.tanh %275 : vector<8x96xf32>
    %cst_94 = arith.constant 5.000000e-01 : f32
    %277 = vector.broadcast %cst_94 : f32 to vector<8x96xf32>
    %278 = arith.mulf %276, %277 : vector<8x96xf32>
    %cst_95 = arith.constant 5.000000e-01 : f32
    %279 = vector.broadcast %cst_95 : f32 to vector<8x96xf32>
    %280 = arith.addf %278, %279 : vector<8x96xf32>
    %281 = vector.extract_strided_slice %272 {offsets = [0, 96], sizes = [8, 32], strides = [1, 1]} : vector<8x128xf32> to vector<8x32xf32>
    %282 = math.tanh %281 : vector<8x32xf32>
    %283 = vector.extract_strided_slice %280 {offsets = [0, 0], sizes = [8, 32], strides = [1, 1]} : vector<8x96xf32> to vector<8x32xf32>
    %284 = vector.extract_strided_slice %280 {offsets = [0, 32], sizes = [8, 32], strides = [1, 1]} : vector<8x96xf32> to vector<8x32xf32>
    %285 = vector.extract_strided_slice %280 {offsets = [0, 64], sizes = [8, 32], strides = [1, 1]} : vector<8x96xf32> to vector<8x32xf32>
    %286 = arith.mulf %284, %266 : vector<8x32xf32>
    %287 = arith.mulf %283, %282 : vector<8x32xf32>
    %288 = arith.addf %286, %287 : vector<8x32xf32>
    %289 = math.tanh %288 : vector<8x32xf32>
    %290 = arith.mulf %285, %289 : vector<8x32xf32>
    %c24_96 = arith.constant 24 : index
    %c0_97 = arith.constant 0 : index
    %291 = vector.load %arg14[%c24_96, %c0_97] : memref<64x32xf32, #tpu.memory_space<vmem>>, vector<8x32xf32>
    tpu.vector_store %arg14[%c24_96, %c0_97], %290 {strides = array<i32>} : memref<64x32xf32, #tpu.memory_space<vmem>>, vector<8x32xf32>,
    %292 = vector.extract_strided_slice %199 {offsets = [32, 0], sizes = [8, 128], strides = [1, 1]} : vector<64x128xf32> to vector<8x128xf32>
    %cst_98 = arith.constant dense<0.000000e+00> : vector<8x128xf32>
    %293 = tpu.matmul %290, %195, %cst_98 {dimension_numbers = #tpu.dot_dimension_numbers<[1], [0], [0], [1], [0, 0, 1, 1], [], []>} : vector<8x32xf32>, vector<32x128xf32>, vector<8x128xf32> -> vector<8x128xf32>
    %294 = arith.addf %292, %293 : vector<8x128xf32>
    %295 = vector.extract_strided_slice %294 {offsets = [0, 0], sizes = [8, 96], strides = [1, 1]} : vector<8x128xf32> to vector<8x96xf32>
    %cst_99 = arith.constant 5.000000e-01 : f32
    %296 = vector.broadcast %cst_99 : f32 to vector<8x96xf32>
    %297 = arith.mulf %296, %295 : vector<8x96xf32>
    %298 = math.tanh %297 : vector<8x96xf32>
    %cst_100 = arith.constant 5.000000e-01 : f32
    %299 = vector.broadcast %cst_100 : f32 to vector<8x96xf32>
    %300 = arith.mulf %298, %299 : vector<8x96xf32>
    %cst_101 = arith.constant 5.000000e-01 : f32
    %301 = vector.broadcast %cst_101 : f32 to vector<8x96xf32>
    %302 = arith.addf %300, %301 : vector<8x96xf32>
    %303 = vector.extract_strided_slice %294 {offsets = [0, 96], sizes = [8, 32], strides = [1, 1]} : vector<8x128xf32> to vector<8x32xf32>
    %304 = math.tanh %303 : vector<8x32xf32>
    %305 = vector.extract_strided_slice %302 {offsets = [0, 0], sizes = [8, 32], strides = [1, 1]} : vector<8x96xf32> to vector<8x32xf32>
    %306 = vector.extract_strided_slice %302 {offsets = [0, 32], sizes = [8, 32], strides = [1, 1]} : vector<8x96xf32> to vector<8x32xf32>
    %307 = vector.extract_strided_slice %302 {offsets = [0, 64], sizes = [8, 32], strides = [1, 1]} : vector<8x96xf32> to vector<8x32xf32>
    %308 = arith.mulf %306, %288 : vector<8x32xf32>
    %309 = arith.mulf %305, %304 : vector<8x32xf32>
    %310 = arith.addf %308, %309 : vector<8x32xf32>
    %311 = math.tanh %310 : vector<8x32xf32>
    %312 = arith.mulf %307, %311 : vector<8x32xf32>
    %c32_102 = arith.constant 32 : index
    %c0_103 = arith.constant 0 : index
    %313 = vector.load %arg14[%c32_102, %c0_103] : memref<64x32xf32, #tpu.memory_space<vmem>>, vector<8x32xf32>
    tpu.vector_store %arg14[%c32_102, %c0_103], %312 {strides = array<i32>} : memref<64x32xf32, #tpu.memory_space<vmem>>, vector<8x32xf32>,
    %314 = vector.extract_strided_slice %199 {offsets = [40, 0], sizes = [8, 128], strides = [1, 1]} : vector<64x128xf32> to vector<8x128xf32>
    %cst_104 = arith.constant dense<0.000000e+00> : vector<8x128xf32>
    %315 = tpu.matmul %312, %195, %cst_104 {dimension_numbers = #tpu.dot_dimension_numbers<[1], [0], [0], [1], [0, 0, 1, 1], [], []>} : vector<8x32xf32>, vector<32x128xf32>, vector<8x128xf32> -> vector<8x128xf32>
    %316 = arith.addf %314, %315 : vector<8x128xf32>
    %317 = vector.extract_strided_slice %316 {offsets = [0, 0], sizes = [8, 96], strides = [1, 1]} : vector<8x128xf32> to vector<8x96xf32>
    %cst_105 = arith.constant 5.000000e-01 : f32
    %318 = vector.broadcast %cst_105 : f32 to vector<8x96xf32>
    %319 = arith.mulf %318, %317 : vector<8x96xf32>
    %320 = math.tanh %319 : vector<8x96xf32>
    %cst_106 = arith.constant 5.000000e-01 : f32
    %321 = vector.broadcast %cst_106 : f32 to vector<8x96xf32>
    %322 = arith.mulf %320, %321 : vector<8x96xf32>
    %cst_107 = arith.constant 5.000000e-01 : f32
    %323 = vector.broadcast %cst_107 : f32 to vector<8x96xf32>
    %324 = arith.addf %322, %323 : vector<8x96xf32>
    %325 = vector.extract_strided_slice %316 {offsets = [0, 96], sizes = [8, 32], strides = [1, 1]} : vector<8x128xf32> to vector<8x32xf32>
    %326 = math.tanh %325 : vector<8x32xf32>
    %327 = vector.extract_strided_slice %324 {offsets = [0, 0], sizes = [8, 32], strides = [1, 1]} : vector<8x96xf32> to vector<8x32xf32>
    %328 = vector.extract_strided_slice %324 {offsets = [0, 32], sizes = [8, 32], strides = [1, 1]} : vector<8x96xf32> to vector<8x32xf32>
    %329 = vector.extract_strided_slice %324 {offsets = [0, 64], sizes = [8, 32], strides = [1, 1]} : vector<8x96xf32> to vector<8x32xf32>
    %330 = arith.mulf %328, %310 : vector<8x32xf32>
    %331 = arith.mulf %327, %326 : vector<8x32xf32>
    %332 = arith.addf %330, %331 : vector<8x32xf32>
    %333 = math.tanh %332 : vector<8x32xf32>
    %334 = arith.mulf %329, %333 : vector<8x32xf32>
    %c40_108 = arith.constant 40 : index
    %c0_109 = arith.constant 0 : index
    %335 = vector.load %arg14[%c40_108, %c0_109] : memref<64x32xf32, #tpu.memory_space<vmem>>, vector<8x32xf32>
    tpu.vector_store %arg14[%c40_108, %c0_109], %334 {strides = array<i32>} : memref<64x32xf32, #tpu.memory_space<vmem>>, vector<8x32xf32>,
    %336 = vector.extract_strided_slice %199 {offsets = [48, 0], sizes = [8, 128], strides = [1, 1]} : vector<64x128xf32> to vector<8x128xf32>
    %cst_110 = arith.constant dense<0.000000e+00> : vector<8x128xf32>
    %337 = tpu.matmul %334, %195, %cst_110 {dimension_numbers = #tpu.dot_dimension_numbers<[1], [0], [0], [1], [0, 0, 1, 1], [], []>} : vector<8x32xf32>, vector<32x128xf32>, vector<8x128xf32> -> vector<8x128xf32>
    %338 = arith.addf %336, %337 : vector<8x128xf32>
    %339 = vector.extract_strided_slice %338 {offsets = [0, 0], sizes = [8, 96], strides = [1, 1]} : vector<8x128xf32> to vector<8x96xf32>
    %cst_111 = arith.constant 5.000000e-01 : f32
    %340 = vector.broadcast %cst_111 : f32 to vector<8x96xf32>
    %341 = arith.mulf %340, %339 : vector<8x96xf32>
    %342 = math.tanh %341 : vector<8x96xf32>
    %cst_112 = arith.constant 5.000000e-01 : f32
    %343 = vector.broadcast %cst_112 : f32 to vector<8x96xf32>
    %344 = arith.mulf %342, %343 : vector<8x96xf32>
    %cst_113 = arith.constant 5.000000e-01 : f32
    %345 = vector.broadcast %cst_113 : f32 to vector<8x96xf32>
    %346 = arith.addf %344, %345 : vector<8x96xf32>
    %347 = vector.extract_strided_slice %338 {offsets = [0, 96], sizes = [8, 32], strides = [1, 1]} : vector<8x128xf32> to vector<8x32xf32>
    %348 = math.tanh %347 : vector<8x32xf32>
    %349 = vector.extract_strided_slice %346 {offsets = [0, 0], sizes = [8, 32], strides = [1, 1]} : vector<8x96xf32> to vector<8x32xf32>
    %350 = vector.extract_strided_slice %346 {offsets = [0, 32], sizes = [8, 32], strides = [1, 1]} : vector<8x96xf32> to vector<8x32xf32>
    %351 = vector.extract_strided_slice %346 {offsets = [0, 64], sizes = [8, 32], strides = [1, 1]} : vector<8x96xf32> to vector<8x32xf32>
    %352 = arith.mulf %350, %332 : vector<8x32xf32>
    %353 = arith.mulf %349, %348 : vector<8x32xf32>
    %354 = arith.addf %352, %353 : vector<8x32xf32>
    %355 = math.tanh %354 : vector<8x32xf32>
    %356 = arith.mulf %351, %355 : vector<8x32xf32>
    %c48_114 = arith.constant 48 : index
    %c0_115 = arith.constant 0 : index
    %357 = vector.load %arg14[%c48_114, %c0_115] : memref<64x32xf32, #tpu.memory_space<vmem>>, vector<8x32xf32>
    tpu.vector_store %arg14[%c48_114, %c0_115], %356 {strides = array<i32>} : memref<64x32xf32, #tpu.memory_space<vmem>>, vector<8x32xf32>,
    %358 = vector.extract_strided_slice %199 {offsets = [56, 0], sizes = [8, 128], strides = [1, 1]} : vector<64x128xf32> to vector<8x128xf32>
    %cst_116 = arith.constant dense<0.000000e+00> : vector<8x128xf32>
    %359 = tpu.matmul %356, %195, %cst_116 {dimension_numbers = #tpu.dot_dimension_numbers<[1], [0], [0], [1], [0, 0, 1, 1], [], []>} : vector<8x32xf32>, vector<32x128xf32>, vector<8x128xf32> -> vector<8x128xf32>
    %360 = arith.addf %358, %359 : vector<8x128xf32>
    %361 = vector.extract_strided_slice %360 {offsets = [0, 0], sizes = [8, 96], strides = [1, 1]} : vector<8x128xf32> to vector<8x96xf32>
    %cst_117 = arith.constant 5.000000e-01 : f32
    %362 = vector.broadcast %cst_117 : f32 to vector<8x96xf32>
    %363 = arith.mulf %362, %361 : vector<8x96xf32>
    %364 = math.tanh %363 : vector<8x96xf32>
    %cst_118 = arith.constant 5.000000e-01 : f32
    %365 = vector.broadcast %cst_118 : f32 to vector<8x96xf32>
    %366 = arith.mulf %364, %365 : vector<8x96xf32>
    %cst_119 = arith.constant 5.000000e-01 : f32
    %367 = vector.broadcast %cst_119 : f32 to vector<8x96xf32>
    %368 = arith.addf %366, %367 : vector<8x96xf32>
    %369 = vector.extract_strided_slice %360 {offsets = [0, 96], sizes = [8, 32], strides = [1, 1]} : vector<8x128xf32> to vector<8x32xf32>
    %370 = math.tanh %369 : vector<8x32xf32>
    %371 = vector.extract_strided_slice %368 {offsets = [0, 0], sizes = [8, 32], strides = [1, 1]} : vector<8x96xf32> to vector<8x32xf32>
    %372 = vector.extract_strided_slice %368 {offsets = [0, 32], sizes = [8, 32], strides = [1, 1]} : vector<8x96xf32> to vector<8x32xf32>
    %373 = vector.extract_strided_slice %368 {offsets = [0, 64], sizes = [8, 32], strides = [1, 1]} : vector<8x96xf32> to vector<8x32xf32>
    %374 = arith.mulf %372, %354 : vector<8x32xf32>
    %375 = arith.mulf %371, %370 : vector<8x32xf32>
    %376 = arith.addf %374, %375 : vector<8x32xf32>
    %377 = math.tanh %376 : vector<8x32xf32>
    %378 = arith.mulf %373, %377 : vector<8x32xf32>
    %c56_120 = arith.constant 56 : index
    %c0_121 = arith.constant 0 : index
    %379 = vector.load %arg14[%c56_120, %c0_121] : memref<64x32xf32, #tpu.memory_space<vmem>>, vector<8x32xf32>
    tpu.vector_store %arg14[%c56_120, %c0_121], %378 {strides = array<i32>} : memref<64x32xf32, #tpu.memory_space<vmem>>, vector<8x32xf32>,
    %c1_122 = arith.constant 1 : index
    %c0_123 = arith.constant 0 : index
    %c0_124 = arith.constant 0 : index
    %380 = vector.load %arg12[%c1_122, %c0_123, %c0_124] : memref<2x8x32xf32, #tpu.memory_space<vmem>>, vector<1x8x32xf32>
    %381 = vector.shape_cast %380 : vector<1x8x32xf32> to vector<8x32xf32>
    %382 = vector.shape_cast %378 : vector<8x32xf32> to vector<1x8x32xf32>
    tpu.vector_store %arg12[%c1_122, %c0_123, %c0_124], %382 {strides = array<i32>} : memref<2x8x32xf32, #tpu.memory_space<vmem>>, vector<1x8x32xf32>,
    %c1_125 = arith.constant 1 : index
    %c0_126 = arith.constant 0 : index
    %c0_127 = arith.constant 0 : index
    %383 = vector.load %arg13[%c1_125, %c0_126, %c0_127] : memref<2x8x32xf32, #tpu.memory_space<vmem>>, vector<1x8x32xf32>
    %384 = vector.shape_cast %383 : vector<1x8x32xf32> to vector<8x32xf32>
    %385 = vector.shape_cast %376 : vector<8x32xf32> to vector<1x8x32xf32>
    tpu.vector_store %arg13[%c1_125, %c0_126, %c0_127], %385 {strides = array<i32>} : memref<2x8x32xf32, #tpu.memory_space<vmem>>, vector<1x8x32xf32>,
    %c0_128 = arith.constant 0 : index
    %c0_129 = arith.constant 0 : index
    %386 = vector.load %arg14[%c0_128, %c0_129] : memref<64x32xf32, #tpu.memory_space<vmem>>, vector<64x32xf32>
    %c0_130 = arith.constant 0 : index
    %c0_131 = arith.constant 0 : index
    %387 = vector.load %arg9[%c0_130, %c0_131] : memref<32x16xf32, #tpu.memory_space<vmem>>, vector<32x16xf32>
    %cst_132 = arith.constant dense<0.000000e+00> : vector<64x16xf32>
    %388 = tpu.matmul %386, %387, %cst_132 {dimension_numbers = #tpu.dot_dimension_numbers<[1], [0], [0], [1], [0, 0, 1, 1], [], []>} : vector<64x32xf32>, vector<32x16xf32>, vector<64x16xf32> -> vector<64x16xf32>
    %c0_133 = arith.constant 0 : index
    %c0_134 = arith.constant 0 : index
    %389 = vector.load %arg10[%c0_133, %c0_134] : memref<1x16xf32, #tpu.memory_space<vmem>>, vector<1x16xf32>
    %390 = vector.broadcast %389 : vector<1x16xf32> to vector<64x16xf32>
    %391 = arith.addf %388, %390 : vector<64x16xf32>
    %c0_135 = arith.constant 0 : index
    %c0_136 = arith.constant 0 : index
    %392 = vector.load %arg11[%c0_135, %c0_136] : memref<64x16xf32, #tpu.memory_space<vmem>>, vector<64x16xf32>
    tpu.vector_store %arg11[%c0_135, %c0_136], %391 {strides = array<i32>} : memref<64x16xf32, #tpu.memory_space<vmem>>, vector<64x16xf32>,
    return
  }
}

</mosaic_0001>

<bundles_post_ra>
// kernel: tpu_custom_call.1
= control target key start
LH: loop header
LB: loop body
LE: loop exit
PB: predicated region body
PF: predicated region fallthrough
CT: control target
= control target key end

     0   :  { %19 = vsyncpa [#allocation4], 0  ;;  %s3484_s0 = inlined_call_operand.vmem [shape: f32[64,16], index: 0, kind: input, shape index: {}]   ;;  %s3485_s1 = inlined_call_operand.vmem [shape: f32[2,8,32], index: 1, kind: input, shape index: {}]   ;;  %s3486_s2 = inlined_call_operand.hbm [shape: f32[2,8,32], index: 2, kind: input, shape index: {}]   ;;  %s3487_s3 = inlined_call_operand.hbm [shape: f32[16,128], index: 3, kind: input, shape index: {}]   ;;  %s3488_s4 = inlined_call_operand.vmem [shape: f32[32,128], index: 4, kind: input, shape index: {}]   ;;  %s3489_s5 = inlined_call_operand.vmem [shape: f32[1,128], index: 5, kind: input, shape index: {}]   ;;  %s3490_s6 = inlined_call_operand.vmem [shape: f32[32,128], index: 6, kind: input, shape index: {}]   ;;  %s3491_s7 = inlined_call_operand.vmem [shape: f32[32,128], index: 7, kind: input, shape index: {}]   ;;  %s3492_s8 = inlined_call_operand.vmem [shape: f32[1,128], index: 8, kind: input, shape index: {}]   ;;  %s3493_s9 = inlined_call_operand.vmem [shape: f32[32,16], index: 9, kind: input, shape index: {}]   ;;  %s3494_s10 = inlined_call_operand.vmem [shape: f32[1,16], index: 10, kind: input, shape index: {}]   ;;  %s3495_s11 = inlined_call_operand.vmem [shape: f32[64,16], index: 11, kind: output, shape index: {0}]   ;;  %s3496_s12 = inlined_call_operand.hbm [shape: f32[2,8,32], index: 12, kind: output, shape index: {1}]   ;;  %s3497_s13 = inlined_call_operand.hbm [shape: f32[2,8,32], index: 13, kind: output, shape index: {2}]  }
   0x1   :  { %20 = vsyncpa [#allocation7], 0 }
   0x2   :  { %21 = vsyncpa [#allocation5], 0 }
   0x3   :  { %22 = vsyncpa [#allocation10], 0  ;;  %s2911_s25 = smov [#allocation3]   ;;  %s2815_s29 = scalar_lea.hbm %s3486_s2, 256 }
   0x4   :  { %s32_s26 = sshll.u32 %s2911_s25, 4  ;;  %p2816_p0 = scmp.ne.s32.totalorder %s3486_s2, %s2815_s29  ;;  %s33_s26 = int_to_ptr.vmem [resolvable:$true] %s32_s26 }
   0x5   :  { %p2819_p1 = scmp.lt.u32.totalorder %s2815_s29, %s3486_s2 }
   0x7   :  { %p2821_p2 = pnand %p2819_p1, %p2816_p0 }
   0x9   :  { %2824 = shalt.err (!%p2821_p2)
}
   0xa   :  { %s2825_s17 = scalar_lea.vmem %s33_s26, 256  ;;  %p2830_p4 = scmp.lt.s32.totalorder %s33_s26, %s33_s26 }
   0xb   :  { %p2826_p3 = scmp.ne.s32.totalorder %s33_s26, %s2825_s17  ;;  %p2831_p5 = scmp.lt.s32.totalorder %s2825_s17, %s2825_s17 }
   0xd   :  { %p2832_p6 = por %p2831_p5, %p2830_p4 }
   0xf   :  { %p2833_p7 = pnand %p2832_p6, %p2826_p3 }
  0x11   :  { %2836 = shalt.err (!%p2833_p7)
}
  0x12   :  { %s2912_s18 = smov 128   ;;  %s2913_s19 = smov 8  }
  0x13   :  { %38 = dma.hbm_to_vmem [thread:$0]  %s3486_s2, 256, %s33_s26, [#allocation4], %s2912_s18, %s2912_s18, %s2913_s19  }
  0x14   :  { %s2914_s22 = smov [#allocation6]   ;;  %s2837_s27 = scalar_lea.hbm %s3487_s3, 256 }
  0x15   :  { %s44_s23 = sshll.u32 %s2914_s22, 4  ;;  %p2838_p8 = scmp.ne.s32.totalorder %s3487_s3, %s2837_s27  ;;  %s45_s23 = int_to_ptr.vmem [resolvable:$true] %s44_s23 }
  0x16   :  { %p2841_p9 = scmp.lt.u32.totalorder %s2837_s27, %s3487_s3 }
  0x18   :  { %p2843_p10 = pnand %p2841_p9, %p2838_p8 }
  0x1a   :  { %2846 = shalt.err (!%p2843_p10)
}
  0x1b   :  { %s2847_s15 = scalar_lea.vmem %s45_s23, 256  ;;  %p2852_p12 = scmp.lt.s32.totalorder %s45_s23, %s45_s23 }
  0x1c   :  { %p2848_p11 = scmp.ne.s32.totalorder %s45_s23, %s2847_s15  ;;  %p2853_p13 = scmp.lt.s32.totalorder %s2847_s15, %s2847_s15 }
  0x1e   :  { %p2854_p0 = por %p2853_p13, %p2852_p12 }
  0x20   :  { %p2855_p1 = pnand %p2854_p0, %p2848_p11 }
  0x22   :  { %2858 = shalt.err (!%p2855_p1)
}
  0x23   :  { %50 = dma.hbm_to_vmem [thread:$0]  %s3487_s3, 256, %s45_s23, [#allocation7], %s2912_s18, %s2912_s18, %s2913_s19  }
  0x24   :  { %2903 = dma.done.wait [#allocation4], 256  }
  0x25   :  { %2904 = vsyncadd [#allocation4], 4294967040 }
  0x26   :  { %2905 = dma.done.wait [#allocation7], 256  }
  0x27   :  { %2906 = vsyncadd [#allocation7], 4294967040  ;;  %vm92_vm0 = vcmask 130048   ;;  %v79_v0 = vld [vmem:[#allocation6] sm:$0xff]  ;;  %v80_v1 = vld [vmem:[#allocation6 + $0x8] sm:$0xff]  ;;  %v2915_v10 = vmov 0.0|0.0  }
  0x28   :  { %v75_v2 = vld [vmem:[%s3484_s0 + $0x20] sm:$0xff]  ;;  %v2589_v3 = vpack.c.bf16 %v80_v1, %v79_v0  ;;  %v82_v5 = vld [vmem:[%s3488_s4 + $0x8] sm:$0xff]  ;;  %v77_v11 = vld [vmem:[%s3484_s0 + $0x30] sm:$0xff]  ;;  %vm2916_vm1 = vmmov 0   ;;  %v2917_v16 = vmov 0.0   ;;  %vm224_vm2 = vcmask 261120  }
  0x29   :  { %2367 = vmatprep.mubr.msk.f32.mxu1 %vm92_vm0, %v75_v2  ;;  %v81_v4 = vld [vmem:[%s3488_s4] sm:$0xff]  ;;  %v76_v7 = vld [vmem:[%s3484_s0 + $0x28] sm:$0xff]  ;;  %v83_v12 = vld [vmem:[%s3488_s4 + $0x10] sm:$0xff]  ;;  %s2918_s23 = smov 32  }
  0x2a   :  { %v71_v6 = vld [vmem:[%s3484_s0] sm:$0xff]  ;;  %2705 = vmatprep.subr.bf16.mxu1 %v2589_v3  ;;  %2590 = vmatprep.subr.bf16.mxu0 %v2589_v3  ;;  %v3039_v8 = vpack.c.bf16 %v82_v5, %v81_v4  ;;  %v72_v9 = vld [vmem:[%s3484_s0 + $0x8] sm:$0xff]  ;;  %v84_v13 = vld [vmem:[%s3488_s4 + $0x18] sm:$0xff] }
  0x2b   :  { %2706 = vmatpush3.bf16.msra.mxu1 %v2589_v3  ;;  %2592 = vmatpush3.bf16.msra.mxu0 %v2589_v3  ;;  %v78_v14 = vld [vmem:[%s3484_s0 + $0x38] sm:$0xff]  ;;  %v3063_v15 = vpack.c.bf16 %v84_v13, %v83_v12  ;;  %v222_v17 = vld [vmem:[%s3485_s1] sm:$0xff]  ;;  %v73_v59 = vld [vmem:[%s3484_s0 + $0x10] sm:$0xff] }
  0x2c   :  { %2593 = vmatprep.subr.bf16.mxu1 %v2915_v10  ;;  %2361 = vmatprep.mubr.msk.f32.mxu0 %vm92_vm0, %v71_v6  ;;  %v3092_v22 = vld [vmem:[%s3489_s5] ss:$0 sm:$0xff]  ;;  %s2919_s5 = smov 64   ;;  %v74_v60 = vld [vmem:[%s3484_s0 + $0x18] sm:$0xff] }
  0x2d   :  { %2605 = vmatprep.subr.bf16.mxu0 %v2915_v10  ;;  %v223_v30 = vld [vmem:[#allocation3] sm:$0xff] }
  0x2e   :  { %2368 = vmatmul.mubr.msk.f32.vlgmr.msra.gmra.mrb[0].mxu1 %vm92_vm0, %v76_v7  ;;  %2362 = vmatmul.mubr.msk.f32.vlgmr.msra.gmra.mrb[0].mxu0 %vm92_vm0, %v72_v9 }
  0x2f   :  { %2595 = vmatpush3.bf16.msra.mxu1 %v3039_v8  ;;  %2370 = vmatprep.mubr.msk.f32.mxu1 %vm92_vm0, %v77_v11 }
  0x30   :  { %2596 = vmatprep.subr.bf16.mxu1 %v2915_v10  ;;  %2607 = vmatpush3.bf16.msra.mxu0 %v3039_v8 }
  0x31   :  { %2608 = vmatprep.subr.bf16.mxu0 %v2915_v10  ;;  %2364 = vmatprep.mubr.msk.f32.mxu0 %vm92_vm0, %v73_v59 }
  0x32   :  { %2371 = vmatmul.mubr.msk.f32.gmra.mrb[2].mxu1 %vm92_vm0, %v78_v14  ;;  %2365 = vmatmul.mubr.msk.f32.gmra.mrb[2].mxu0 %vm92_vm0, %v74_v60 }
  0x33   :  { %2598 = vmatpush3.bf16.msra.mxu1 %v3063_v15  ;;  %2381 = vmatprep.mubr.msk.f32.mxu1 %vm2916_vm1, %v2917_v16 }
  0x34   :  { %2599 = vmatprep.subr.bf16.mxu1 %v2915_v10  ;;  %2610 = vmatpush3.bf16.msra.mxu0 %v3063_v15 }
  0x35   :  { %2617 = vmatprep.subr.bf16.mxu0 %v2915_v10  ;;  %2403 = vmatprep.mubr.msk.f32.mxu0 %vm2916_vm1, %v2917_v16 }
  0x36   :  { %2382 = vmatmul.mubr.msk.f32.vlgmr.msra.gmra.mrb[4].mxu1 %vm224_vm2, %v222_v17 }
  0x37   :  { %2601 = vmatpush3.bf16.msra.mxu1 %v3039_v8  ;;  %2392 = vmatprep.mubr.msk.f32.mxu1 %vm2916_vm1, %v2917_v16 }
  0x38   :  { %2602 = vmatprep.subr.bf16.mxu1 %v2915_v10 }
  0x3b   :  { %2604 = vmatpush3.bf16.msra.mxu1 %v3063_v15 }
  0x3c   :  { %2611 = vmatprep.subr.bf16.mxu1 %v2915_v10 }
 0x101   :  { %v3085_v18 = vpop.f32.mrb[0].mxu1  ;;  %v2363_v19 = vpop.f32.mrb[0].mxu0 }
 0x102   :  { %v3087_v20 = vpop.f32.mrb[1].mxu1  ;;  %v183_v21 = vpop.f32.mrb[1].mxu0  ;;  %v189_v45 = vadd.f32 %v2363_v19, %v3092_v22 }
 0x103   :  { %v184_v25 = vadd.f32 %v3092_v22, %v183_v21 }
 0x105   :  { %v3094_v23 = vpop.f32.mrb[2].mxu1  ;;  %v2366_v0 = vpop.f32.mrb[2].mxu0 }
 0x106   :  { %v3096_v24 = vpop.f32.mrb[3].mxu1  ;;  %v193_v1 = vpop.f32.mrb[3].mxu0 }
 0x107   :  { %v194_v3 = vadd.f32 %v3092_v22, %v193_v1  ;;  %v209_v1 = vadd.f32 %v3085_v18, %v3092_v22  ;;  %v1044_v18 = vld [vmem:[%s3490_s6] sm:$0xff] }
 0x109   :  { %v294_v26 = vpop.f32.mrb[4].mxu1 }
 0x10a   :  { %v298_v27 = vadd.f32 %v294_v26, %v184_v25  ;;  %v2383_v28 = vpop.f32.mrb[5].mxu1 }
 0x10c   :  { %2719 = vtanh.f32 %v298_v27  ;;  %v299_v31 = vmul.f32 0.5, %v298_v27 }
 0x10e   :  { %2721 = vtanh.f32 %v299_v31 }
 0x116   :  { %v2720_v29 = vpop.eup %2719 }
 0x117   :  { %310 = vrot.lane.b32.xlu0 %v2720_v29, %s2918_s23 }
 0x118   :  { %v2722_v32 = vpop.eup %2721 }
 0x119   :  { %v301_v33 = vmul.f32 0.5, %v2722_v32 }
 0x11b   :  { %305 = vrot.lane.b32.xlu0 %v223_v30, %s2918_s23  ;;  %v302_v34 = vadd.f32 0.5, %v301_v33  ;;  %v199_v30 = vadd.f32 %v2366_v0, %v3092_v22 }
 0x189   :  { %v311_v35 = vpop.permute.xlu0 %310 }
 0x18a   :  { %v313_v36 = vmul.f32 %v311_v35, %v302_v34 }
 0x18c   :  { %315 = vrot.lane.b32.xlu1 %v313_v36, %s2918_s23 }
 0x18d   :  { %v306_v37 = vpop.permute.xlu0 %305 }
 0x18e   :  { %v308_v38 = vmul.f32 %v306_v37, %v302_v34 }
 0x1fe   :  { %v316_v39 = vpop.permute.xlu1 %315 }
 0x1ff   :  { %v318_v40 = vadd.f32 %v316_v39, %v308_v38 }
 0x201   :  { %2723 = vtanh.f32 %v318_v40 }
 0x20b   :  { %v2724_v41 = vpop.eup %2723 }
 0x20c   :  { %321 = vrot.lane.b32.xlu1 %v2724_v41, %s2918_s23 }
 0x27e   :  { %v322_v42 = vpop.permute.xlu1 %321 }
 0x27f   :  { %v324_v43 = vmul.f32 %v322_v42, %v302_v34 }
 0x281   :  { %326 = vrot.lane.b32.xlu0 %v324_v43, %s2919_s5 }
 0x2f3   :  { %v327_v44 = vpop.permute.xlu0 %326 }
 0x2f4   :  { %329 = vst.msk [vmem:[#allocation2] sm:$0xff] %vm224_vm2, %v327_v44  ;;  %2393 = vmatmul.mubr.msk.f32.vlgmr.msra.gmra.mrb[6].mxu1 %vm224_vm2, %v327_v44 }
 0x2f5   :  { %2613 = vmatpush3.bf16.msra.mxu1 %v3039_v8  ;;  %2414 = vmatprep.mubr.msk.f32.mxu1 %vm2916_vm1, %v2917_v16 }
 0x2f6   :  { %2614 = vmatprep.subr.bf16.mxu1 %v2915_v10 }
 0x2f9   :  { %2616 = vmatpush3.bf16.msra.mxu1 %v3063_v15 }
 0x2fa   :  { %2623 = vmatprep.subr.bf16.mxu1 %v2915_v10 }
 0x3c7   :  { %v398_v46 = vpop.f32.mrb[6].mxu1 }
 0x3c8   :  { %v402_v47 = vadd.f32 %v398_v46, %v189_v45  ;;  %v2394_v48 = vpop.f32.mrb[7].mxu1 }
 0x3c9   :  { %v204_v48 = vadd.f32 %v3092_v22, %v3087_v20 }
 0x3ca   :  { %2725 = vtanh.f32 %v402_v47  ;;  %v403_v50 = vmul.f32 0.5, %v402_v47 }
 0x3cc   :  { %2727 = vtanh.f32 %v403_v50 }
 0x3d4   :  { %v2726_v49 = vpop.eup %2725 }
 0x3d5   :  { %410 = vrot.lane.b32.xlu1 %v2726_v49, %s2918_s23 }
 0x3d6   :  { %v2728_v51 = vpop.eup %2727 }
 0x3d7   :  { %v405_v52 = vmul.f32 0.5, %v2728_v51 }
 0x3d9   :  { %v406_v53 = vadd.f32 0.5, %v405_v52 }
 0x3db   :  { %v408_v56 = vmul.f32 %v406_v53, %v318_v40 }
 0x447   :  { %v411_v54 = vpop.permute.xlu1 %410 }
 0x448   :  { %v413_v55 = vmul.f32 %v411_v54, %v406_v53 }
 0x44a   :  { %415 = vrot.lane.b32.xlu0 %v413_v55, %s2918_s23 }
 0x4bc   :  { %v416_v57 = vpop.permute.xlu0 %415 }
 0x4bd   :  { %v418_v58 = vadd.f32 %v416_v57, %v408_v56 }
 0x4bf   :  { %2729 = vtanh.f32 %v418_v58 }
 0x4c9   :  { %v2730_v61 = vpop.eup %2729 }
 0x4ca   :  { %421 = vrot.lane.b32.xlu1 %v2730_v61, %s2918_s23 }
 0x53c   :  { %v422_v62 = vpop.permute.xlu1 %421 }
 0x53d   :  { %v424_v63 = vmul.f32 %v422_v62, %v406_v53 }
 0x53f   :  { %426 = vrot.lane.b32.xlu0 %v424_v63, %s2919_s5 }
 0x5b1   :  { %v427_v2 = vpop.permute.xlu0 %426 }
 0x5b2   :  { %429 = vst.msk [vmem:[#allocation2 + $0x8] sm:$0xff] %vm224_vm2, %v427_v2  ;;  %2404 = vmatmul.mubr.msk.f32.vlgmr.msra.gmra.mrb[4].mxu0 %vm224_vm2, %v427_v2 }
 0x5b3   :  { %2619 = vmatpush3.bf16.msra.mxu0 %v3039_v8  ;;  %2425 = vmatprep.mubr.msk.f32.mxu0 %vm2916_vm1, %v2917_v16 }
 0x5b4   :  { %2620 = vmatprep.subr.bf16.mxu0 %v2915_v10 }
 0x5b7   :  { %2622 = vmatpush3.bf16.msra.mxu0 %v3063_v15 }
 0x5b8   :  { %2629 = vmatprep.subr.bf16.mxu0 %v2915_v10 }
 0x685   :  { %v498_v4 = vpop.f32.mrb[4].mxu0 }
 0x686   :  { %v502_v5 = vadd.f32 %v498_v4, %v194_v3  ;;  %v2405_v6 = vpop.f32.mrb[5].mxu0 }
 0x688   :  { %2731 = vtanh.f32 %v502_v5  ;;  %v503_v9 = vmul.f32 0.5, %v502_v5 }
 0x68a   :  { %2733 = vtanh.f32 %v503_v9 }
 0x692   :  { %v2732_v7 = vpop.eup %2731 }
 0x693   :  { %510 = vrot.lane.b32.xlu1 %v2732_v7, %s2918_s23 }
 0x694   :  { %v2734_v11 = vpop.eup %2733 }
 0x695   :  { %v505_v12 = vmul.f32 0.5, %v2734_v11 }
 0x697   :  { %v506_v13 = vadd.f32 0.5, %v505_v12 }
 0x699   :  { %v508_v19 = vmul.f32 %v506_v13, %v418_v58 }
 0x705   :  { %v511_v14 = vpop.permute.xlu1 %510 }
 0x706   :  { %v513_v17 = vmul.f32 %v511_v14, %v506_v13 }
 0x708   :  { %515 = vrot.lane.b32.xlu0 %v513_v17, %s2918_s23  ;;  %v1045_v17 = vld [vmem:[%s3490_s6 + $0x8] sm:$0xff] }
 0x77a   :  { %v516_v21 = vpop.permute.xlu0 %515 }
 0x77b   :  { %v518_v25 = vadd.f32 %v516_v21, %v508_v19  ;;  %v2641_v19 = vpack.c.bf16 %v1045_v17, %v1044_v18 }
 0x77d   :  { %2735 = vtanh.f32 %v518_v25 }
 0x787   :  { %v2736_v26 = vpop.eup %2735 }
 0x788   :  { %521 = vrot.lane.b32.xlu1 %v2736_v26, %s2918_s23 }
 0x7fa   :  { %v522_v27 = vpop.permute.xlu1 %521 }
 0x7fb   :  { %v524_v28 = vmul.f32 %v522_v27, %v506_v13  ;;  %v1046_v27 = vld [vmem:[%s3490_s6 + $0x10] sm:$0xff] }
 0x7fd   :  { %526 = vrot.lane.b32.xlu0 %v524_v28, %s2919_s5  ;;  %v1047_v28 = vld [vmem:[%s3490_s6 + $0x18] sm:$0xff] }
 0x86f   :  { %v527_v29 = vpop.permute.xlu0 %526 }
 0x870   :  { %529 = vst.msk [vmem:[#allocation2 + $0x10] sm:$0xff] %vm224_vm2, %v527_v29  ;;  %2415 = vmatmul.mubr.msk.f32.vlgmr.msra.gmra.mrb[8].mxu1 %vm224_vm2, %v527_v29  ;;  %v2645_v29 = vpack.c.bf16 %v1047_v28, %v1046_v27 }
 0x871   :  { %2625 = vmatpush3.bf16.msra.mxu1 %v3039_v8  ;;  %2436 = vmatprep.mubr.msk.f32.mxu1 %vm2916_vm1, %v2917_v16 }
 0x872   :  { %2626 = vmatprep.subr.bf16.mxu1 %v2915_v10 }
 0x875   :  { %2628 = vmatpush3.bf16.msra.mxu1 %v3063_v15 }
 0x876   :  { %2635 = vmatprep.subr.bf16.mxu1 %v2915_v10 }
 0x943   :  { %v598_v31 = vpop.f32.mrb[8].mxu1 }
 0x944   :  { %v602_v32 = vadd.f32 %v598_v31, %v199_v30  ;;  %v2416_v33 = vpop.f32.mrb[9].mxu1  ;;  %v1036_v31 = vld [vmem:[#allocation2] sm:$0xff] }
 0x945   :  { %v1038_v33 = vld [vmem:[#allocation2 + $0x10] sm:$0xff] }
 0x946   :  { %2737 = vtanh.f32 %v602_v32  ;;  %v603_v35 = vmul.f32 0.5, %v602_v32  ;;  %v1037_v32 = vld [vmem:[#allocation2 + $0x8] sm:$0xff] }
 0x948   :  { %2739 = vtanh.f32 %v603_v35 }
 0x950   :  { %v2738_v34 = vpop.eup %2737 }
 0x951   :  { %610 = vrot.lane.b32.xlu1 %v2738_v34, %s2918_s23 }
 0x952   :  { %v2740_v36 = vpop.eup %2739 }
 0x953   :  { %v605_v37 = vmul.f32 0.5, %v2740_v36 }
 0x955   :  { %v606_v38 = vadd.f32 0.5, %v605_v37  ;;  %v214_v37 = vadd.f32 %v3092_v22, %v3096_v24 }
 0x957   :  { %v608_v41 = vmul.f32 %v606_v38, %v518_v25 }
 0x9c3   :  { %v611_v39 = vpop.permute.xlu1 %610 }
 0x9c4   :  { %v613_v40 = vmul.f32 %v611_v39, %v606_v38 }
 0x9c6   :  { %615 = vrot.lane.b32.xlu0 %v613_v40, %s2918_s23 }
 0xa38   :  { %v616_v42 = vpop.permute.xlu0 %615 }
 0xa39   :  { %v618_v43 = vadd.f32 %v616_v42, %v608_v41 }
 0xa3b   :  { %2741 = vtanh.f32 %v618_v43 }
 0xa45   :  { %v2742_v44 = vpop.eup %2741 }
 0xa46   :  { %621 = vrot.lane.b32.xlu1 %v2742_v44, %s2918_s23 }
 0xab8   :  { %v622_v45 = vpop.permute.xlu1 %621 }
 0xab9   :  { %v624_v46 = vmul.f32 %v622_v45, %v606_v38 }
 0xabb   :  { %626 = vrot.lane.b32.xlu0 %v624_v46, %s2919_s5 }
 0xb2d   :  { %v627_v47 = vpop.permute.xlu0 %626 }
 0xb2e   :  { %629 = vst.msk [vmem:[#allocation2 + $0x18] sm:$0xff] %vm224_vm2, %v627_v47  ;;  %2426 = vmatmul.mubr.msk.f32.vlgmr.msra.gmra.mrb[6].mxu0 %vm224_vm2, %v627_v47 }
 0xb2f   :  { %2631 = vmatpush3.bf16.msra.mxu0 %v3039_v8  ;;  %2447 = vmatprep.mubr.msk.f32.mxu0 %vm2916_vm1, %v2917_v16 }
 0xb30   :  { %2632 = vmatprep.subr.bf16.mxu0 %v2915_v10 }
 0xb33   :  { %2634 = vmatpush3.bf16.msra.mxu0 %v3063_v15 }
 0xb34   :  { %2642 = vmatprep.subr.bf16.mxu0 %v2641_v19 }
 0xb35   :  { %v1039_v34 = vld [vmem:[#allocation2 + $0x18] sm:$0xff] }
 0xc01   :  { %v698_v49 = vpop.f32.mrb[6].mxu0 }
 0xc02   :  { %v702_v50 = vadd.f32 %v698_v49, %v204_v48  ;;  %v2427_v51 = vpop.f32.mrb[7].mxu0 }
 0xc04   :  { %2743 = vtanh.f32 %v702_v50  ;;  %v703_v53 = vmul.f32 0.5, %v702_v50 }
 0xc06   :  { %2745 = vtanh.f32 %v703_v53 }
 0xc0e   :  { %v2744_v52 = vpop.eup %2743 }
 0xc0f   :  { %710 = vrot.lane.b32.xlu1 %v2744_v52, %s2918_s23 }
 0xc10   :  { %v2746_v54 = vpop.eup %2745 }
 0xc11   :  { %v705_v55 = vmul.f32 0.5, %v2746_v54 }
 0xc13   :  { %v706_v56 = vadd.f32 0.5, %v705_v55 }
 0xc15   :  { %v708_v59 = vmul.f32 %v706_v56, %v618_v43 }
 0xc81   :  { %v711_v57 = vpop.permute.xlu1 %710 }
 0xc82   :  { %v713_v58 = vmul.f32 %v711_v57, %v706_v56  ;;  %v1048_v57 = vld [vmem:[%s3491_s7] sm:$0xff] }
 0xc84   :  { %715 = vrot.lane.b32.xlu0 %v713_v58, %s2918_s23  ;;  %v1049_v58 = vld [vmem:[%s3491_s7 + $0x8] sm:$0xff] }
 0xcf6   :  { %v716_v60 = vpop.permute.xlu0 %715 }
 0xcf7   :  { %v718_v61 = vadd.f32 %v716_v60, %v708_v59  ;;  %v3225_v59 = vpack.c.bf16 %v1049_v58, %v1048_v57  ;;  %v1050_v60 = vld [vmem:[%s3491_s7 + $0x10] sm:$0xff] }
 0xcf9   :  { %2747 = vtanh.f32 %v718_v61 }
 0xd03   :  { %v2748_v20 = vpop.eup %2747 }
 0xd04   :  { %721 = vrot.lane.b32.xlu1 %v2748_v20, %s2918_s23 }
 0xd76   :  { %v722_v62 = vpop.permute.xlu1 %721 }
 0xd77   :  { %v724_v63 = vmul.f32 %v722_v62, %v706_v56 }
 0xd79   :  { %726 = vrot.lane.b32.xlu0 %v724_v63, %s2919_s5 }
 0xdeb   :  { %v727_v0 = vpop.permute.xlu0 %726 }
 0xdec   :  { %729 = vst.msk [vmem:[#allocation2 + $0x20] sm:$0xff] %vm224_vm2, %v727_v0  ;;  %2437 = vmatmul.mubr.msk.f32.vlgmr.msra.gmra.mrb[10].mxu1 %vm224_vm2, %v727_v0  ;;  %v1191_v0 = vld [vmem:[#allocation3 + $0x8] sm:$0xff] }
 0xded   :  { %2637 = vmatpush3.bf16.msra.mxu1 %v3039_v8  ;;  %2458 = vmatprep.mubr.msk.f32.mxu1 %vm2916_vm1, %v2917_v16 }
 0xdee   :  { %2638 = vmatprep.subr.bf16.mxu1 %v2915_v10 }
 0xdf1   :  { %2640 = vmatpush3.bf16.msra.mxu1 %v3063_v15 }
 0xdf2   :  { %2649 = vmatprep.subr.bf16.mxu1 %v2915_v10 }
 0xdf3   :  { %v1040_v35 = vld [vmem:[#allocation2 + $0x20] sm:$0xff] }
 0xebf   :  { %v798_v2 = vpop.f32.mrb[10].mxu1 }
 0xec0   :  { %v802_v3 = vadd.f32 %v798_v2, %v209_v1  ;;  %v2438_v4 = vpop.f32.mrb[11].mxu1  ;;  %v2225_v2 = vld [vmem:[%s3485_s1 + $0x8] sm:$0xff]  ;;  %s2920_s1 = smov 96  }
 0xec1   :  { %v219_v4 = vadd.f32 %v3094_v23, %v3092_v22 }
 0xec2   :  { %2749 = vtanh.f32 %v802_v3  ;;  %v803_v8 = vmul.f32 0.5, %v802_v3 }
 0xec4   :  { %2751 = vtanh.f32 %v803_v8 }
 0xecc   :  { %v2750_v5 = vpop.eup %2749 }
 0xecd   :  { %810 = vrot.lane.b32.xlu1 %v2750_v5, %s2918_s23 }
 0xece   :  { %v2752_v6 = vpop.eup %2751 }
 0xecf   :  { %v805_v7 = vmul.f32 0.5, %v2752_v6 }
 0xed1   :  { %v806_v9 = vadd.f32 0.5, %v805_v7  ;;  %v3265_v7 = vld [vmem:[%s3492_s8] ss:$0 sm:$0xff]  ;;  %s2922_s8 = smov [#allocation9]  }
 0xed2   :  { %s2180_s28 = sshll.u32 %s2922_s8, 4  ;;  %s3437_s28 = int_to_ptr.vmem [resolvable:$true] %s2180_s28 }
 0xed3   :  { %v808_v15 = vmul.f32 %v806_v9, %v718_v61  ;;  %v1051_v61 = vld [vmem:[%s3491_s7 + $0x18] sm:$0xff] }
 0xed4   :  { %v3235_v20 = vpack.c.bf16 %v1051_v61, %v1050_v60 }
 0xf3f   :  { %v811_v11 = vpop.permute.xlu1 %810 }
 0xf40   :  { %v813_v12 = vmul.f32 %v811_v11, %v806_v9 }
 0xf42   :  { %815 = vrot.lane.b32.xlu0 %v813_v12, %s2918_s23 }
 0xfb4   :  { %v816_v13 = vpop.permute.xlu0 %815 }
 0xfb5   :  { %v818_v14 = vadd.f32 %v816_v13, %v808_v15 }
 0xfb7   :  { %2753 = vtanh.f32 %v818_v14 }
 0xfc1   :  { %v2754_v21 = vpop.eup %2753 }
 0xfc2   :  { %821 = vrot.lane.b32.xlu1 %v2754_v21, %s2918_s23 }
0x1034   :  { %v822_v25 = vpop.permute.xlu1 %821 }
0x1035   :  { %v824_v26 = vmul.f32 %v822_v25, %v806_v9 }
0x1037   :  { %826 = vrot.lane.b32.xlu0 %v824_v26, %s2919_s5 }
0x10a9   :  { %v827_v30 = vpop.permute.xlu0 %826 }
0x10aa   :  { %829 = vst.msk [vmem:[#allocation2 + $0x28] sm:$0xff] %vm224_vm2, %v827_v30  ;;  %2448 = vmatmul.mubr.msk.f32.vlgmr.msra.gmra.mrb[8].mxu0 %vm224_vm2, %v827_v30 }
0x10ab   :  { %2644 = vmatpush3.bf16.msra.mxu0 %v2641_v19  ;;  %2469 = vmatprep.mubr.msk.f32.mxu0 %vm224_vm2, %v1036_v31 }
0x10ac   :  { %2646 = vmatprep.subr.bf16.mxu0 %v2645_v29 }
0x10af   :  { %2648 = vmatpush3.bf16.msra.mxu0 %v2645_v29 }
0x10b0   :  { %2661 = vmatprep.subr.bf16.mxu0 %v2915_v10 }
0x10b1   :  { %v1041_v36 = vld [vmem:[#allocation2 + $0x28] sm:$0xff] }
0x10b2   :  { %2470 = vmatmul.mubr.msk.f32.vlgmr.msra.gmra.mrb[10].mxu0 %vm224_vm2, %v1037_v32 }
0x10b3   :  { %2472 = vmatprep.mubr.msk.f32.mxu0 %vm224_vm2, %v1038_v33  ;;  %2663 = vmatpush3.bf16.msra.mxu0 %v3225_v59 }
0x10b4   :  { %2664 = vmatprep.subr.bf16.mxu0 %v2915_v10 }
0x10b6   :  { %2473 = vmatmul.mubr.msk.f32.gmra.mrb[12].mxu0 %vm224_vm2, %v1039_v34 }
0x10b7   :  { %2475 = vmatprep.mubr.msk.f32.mxu0 %vm224_vm2, %v1040_v35  ;;  %2666 = vmatpush3.bf16.msra.mxu0 %v3235_v20 }
0x10b8   :  { %2673 = vmatprep.subr.bf16.mxu0 %v2915_v10 }
0x10ba   :  { %2476 = vmatmul.mubr.msk.f32.gmra.mrb[14].mxu0 %vm224_vm2, %v1041_v36 }
0x117d   :  { %v898_v38 = vpop.f32.mrb[8].mxu0 }
0x117e   :  { %v902_v39 = vadd.f32 %v898_v38, %v214_v37  ;;  %v2449_v40 = vpop.f32.mrb[9].mxu0 }
0x1180   :  { %2755 = vtanh.f32 %v902_v39  ;;  %v903_v48 = vmul.f32 0.5, %v902_v39 }
0x1182   :  { %2757 = vtanh.f32 %v903_v48 }
0x1185   :  { %v3203_v41 = vpop.f32.mrb[10].mxu0 }
0x1186   :  { %v1149_v42 = vpop.f32.mrb[11].mxu0 }
0x1187   :  { %v1150_v9 = vadd.f32 %v3265_v7, %v1149_v42 }
0x1189   :  { %v3205_v43 = vpop.f32.mrb[12].mxu0 }
0x118a   :  { %v2756_v44 = vpop.eup %2755  ;;  %v3207_v45 = vpop.f32.mrb[13].mxu0 }
0x118b   :  { %910 = vrot.lane.b32.xlu1 %v2756_v44, %s2918_s23 }
0x118c   :  { %v2758_v24 = vpop.eup %2757 }
0x118d   :  { %v3210_v46 = vpop.f32.mrb[14].mxu0  ;;  %v905_v49 = vmul.f32 0.5, %v2758_v24 }
0x118e   :  { %v3212_v47 = vpop.f32.mrb[15].mxu0 }
0x118f   :  { %v906_v50 = vadd.f32 0.5, %v905_v49  ;;  %v1155_v49 = vadd.f32 %v3203_v41, %v3265_v7 }
0x1191   :  { %v908_v53 = vmul.f32 %v906_v50, %v818_v14 }
0x11fd   :  { %v911_v51 = vpop.permute.xlu1 %910 }
0x11fe   :  { %v913_v52 = vmul.f32 %v911_v51, %v906_v50 }
0x1200   :  { %915 = vrot.lane.b32.xlu0 %v913_v52, %s2918_s23 }
0x1272   :  { %v916_v54 = vpop.permute.xlu0 %915 }
0x1273   :  { %v3215_v55 = vadd.f32 %v916_v54, %v908_v53 }
0x1275   :  { %2759 = vtanh.f32 %v3215_v55 }
0x127f   :  { %v2760_v56 = vpop.eup %2759 }
0x1280   :  { %921 = vrot.lane.b32.xlu1 %v2760_v56, %s2918_s23 }
0x12f2   :  { %v922_v62 = vpop.permute.xlu1 %921 }
0x12f3   :  { %v924_v63 = vmul.f32 %v922_v62, %v906_v50 }
0x12f5   :  { %926 = vrot.lane.b32.xlu0 %v924_v63, %s2919_s5 }
0x12f9   :  { %1272 = vrot.lane.b32.xlu0 %v1191_v0, %s2918_s23 }
0x1367   :  { %v927_v1 = vpop.permute.xlu0 %926 }
0x1368   :  { %929 = vst.msk [vmem:[#allocation2 + $0x30] sm:$0xff] %vm224_vm2, %v927_v1  ;;  %2459 = vmatmul.mubr.msk.f32.vlgmr.msra.gmra.mrb[12].mxu1 %vm224_vm2, %v927_v1 }
0x1369   :  { %2651 = vmatpush3.bf16.msra.mxu1 %v3225_v59  ;;  %2489 = vmatprep.mubr.msk.f32.mxu1 %vm2916_vm1, %v2917_v16 }
0x136a   :  { %2652 = vmatprep.subr.bf16.mxu1 %v2915_v10 }
0x136b   :  { %v1273_v21 = vpop.permute.xlu0 %1272 }
0x136d   :  { %2654 = vmatpush3.bf16.msra.mxu1 %v3235_v20 }
0x136e   :  { %2655 = vmatprep.subr.bf16.mxu1 %v2915_v10 }
0x136f   :  { %v1042_v3 = vld [vmem:[#allocation2 + $0x30] sm:$0xff] }
0x1370   :  { %2490 = vmatmul.mubr.msk.f32.vlgmr.msra.gmra.mrb[14].mxu1 %vm224_vm2, %v2225_v2  ;;  %2478 = vmatprep.mubr.msk.f32.mxu0 %vm224_vm2, %v1042_v3 }
0x1371   :  { %2657 = vmatpush3.bf16.msra.mxu1 %v3225_v59  ;;  %2500 = vmatprep.mubr.msk.f32.mxu1 %vm2916_vm1, %v2917_v16 }
0x1372   :  { %2658 = vmatprep.subr.bf16.mxu1 %v2915_v10 }
0x1375   :  { %2660 = vmatpush3.bf16.msra.mxu1 %v3235_v20 }
0x1376   :  { %2667 = vmatprep.subr.bf16.mxu1 %v2915_v10 }
0x143b   :  { %v998_v5 = vpop.f32.mrb[12].mxu1 }
0x143c   :  { %v1002_v8 = vadd.f32 %v998_v5, %v219_v4  ;;  %v2460_v6 = vpop.f32.mrb[13].mxu1 }
0x143d   :  { %v1160_v6 = vadd.f32 %v3265_v7, %v3207_v45 }
0x143e   :  { %v1003_v30 = vmul.f32 0.5, %v1002_v8 }
0x1443   :  { %v1261_v11 = vpop.f32.mrb[14].mxu1 }
0x1444   :  { %v1265_v12 = vadd.f32 %v1261_v11, %v1150_v9  ;;  %v2491_v15 = vpop.f32.mrb[15].mxu1 }
0x1446   :  { %2761 = vtanh.f32 %v1265_v12  ;;  %v1266_v14 = vmul.f32 0.5, %v1265_v12 }
0x1448   :  { %2763 = vtanh.f32 %v1266_v14 }
0x1450   :  { %v2762_v13 = vpop.eup %2761 }
0x1451   :  { %1277 = vrot.lane.b32.xlu1 %v2762_v13, %s2918_s23 }
0x1452   :  { %v2764_v22 = vpop.eup %2763 }
0x1453   :  { %v1268_v23 = vmul.f32 0.5, %v2764_v22 }
0x1455   :  { %v1269_v18 = vadd.f32 0.5, %v1268_v23 }
0x1457   :  { %v1275_v25 = vmul.f32 %v1273_v21, %v1269_v18 }
0x14c3   :  { %v1278_v17 = vpop.permute.xlu1 %1277 }
0x14c4   :  { %v1280_v19 = vmul.f32 %v1278_v17, %v1269_v18 }
0x14c6   :  { %1282 = vrot.lane.b32.xlu1 %v1280_v19, %s2918_s23 }
0x1538   :  { %v1283_v26 = vpop.permute.xlu1 %1282 }
0x1539   :  { %v1285_v27 = vadd.f32 %v1283_v26, %v1275_v25 }
0x153b   :  { %2765 = vtanh.f32 %v1285_v27 }
0x153c   :  { %2767 = vtanh.f32 %v1002_v8 }
0x153d   :  { %2769 = vtanh.f32 %v1003_v30 }
0x1545   :  { %v2766_v28 = vpop.eup %2765 }
0x1546   :  { %1288 = vrot.lane.b32.xlu0 %v2766_v28, %s2918_s23  ;;  %v2768_v29 = vpop.eup %2767 }
0x1547   :  { %v2770_v31 = vpop.eup %2769 }
0x1548   :  { %v1005_v32 = vmul.f32 0.5, %v2770_v31 }
0x154a   :  { %1010 = vrot.lane.b32.xlu0 %v2768_v29, %s2918_s23  ;;  %v1006_v35 = vadd.f32 0.5, %v1005_v32  ;;  %v1165_v29 = vadd.f32 %v3205_v43, %v3265_v7 }
0x154c   :  { %v1008_v39 = vmul.f32 %v1006_v35, %v3215_v55 }
0x15b8   :  { %v1289_v33 = vpop.permute.xlu0 %1288 }
0x15b9   :  { %v1291_v34 = vmul.f32 %v1289_v33, %v1269_v18 }
0x15bb   :  { %1293 = vrot.lane.b32.xlu1 %v1291_v34, %s2919_s5 }
0x15bc   :  { %v1011_v36 = vpop.permute.xlu0 %1010 }
0x15bd   :  { %v1013_v37 = vmul.f32 %v1011_v36, %v1006_v35 }
0x15bf   :  { %1015 = vrot.lane.b32.xlu0 %v1013_v37, %s2918_s23 }
0x162d   :  { %v1294_v38 = vpop.permute.xlu1 %1293 }
0x162e   :  { %1296 = vst.msk [vmem:[#allocation2] sm:$0xff] %vm224_vm2, %v1294_v38  ;;  %2501 = vmatmul.mubr.msk.f32.vlgmr.msra.gmra.mrb[16].mxu1 %vm224_vm2, %v1294_v38 }
0x162f   :  { %2669 = vmatpush3.bf16.msra.mxu1 %v3225_v59  ;;  %2522 = vmatprep.mubr.msk.f32.mxu1 %vm2916_vm1, %v2917_v16 }
0x1630   :  { %2670 = vmatprep.subr.bf16.mxu1 %v2915_v10 }
0x1631   :  { %v1016_v40 = vpop.permute.xlu0 %1015 }
0x1632   :  { %v3281_v42 = vadd.f32 %v1016_v40, %v1008_v39 }
0x1633   :  { %2672 = vmatpush3.bf16.msra.mxu1 %v3235_v20 }
0x1634   :  { %2771 = vtanh.f32 %v3281_v42  ;;  %2679 = vmatprep.subr.bf16.mxu1 %v2915_v10 }
0x163e   :  { %v2772_v44 = vpop.eup %2771 }
0x163f   :  { %1021 = vrot.lane.b32.xlu0 %v2772_v44, %s2918_s23 }
0x16b1   :  { %v1022_v48 = vpop.permute.xlu0 %1021 }
0x16b2   :  { %v1024_v24 = vmul.f32 %v1022_v48, %v1006_v35 }
0x16b4   :  { %1026 = vrot.lane.b32.xlu0 %v1024_v24, %s2919_s5 }
0x1701   :  { %v1365_v50 = vpop.f32.mrb[16].mxu1 }
0x1702   :  { %v1369_v51 = vadd.f32 %v1365_v50, %v1155_v49  ;;  %v2502_v52 = vpop.f32.mrb[17].mxu1 }
0x1704   :  { %2773 = vtanh.f32 %v1369_v51  ;;  %v1370_v56 = vmul.f32 0.5, %v1369_v51  ;;  %v1170_v51 = vadd.f32 %v3265_v7, %v3212_v47 }
0x1706   :  { %2775 = vtanh.f32 %v1370_v56 }
0x170e   :  { %v2774_v53 = vpop.eup %2773 }
0x170f   :  { %1377 = vrot.lane.b32.xlu1 %v2774_v53, %s2918_s23 }
0x1710   :  { %v2776_v41 = vpop.eup %2775 }
0x1711   :  { %v1372_v57 = vmul.f32 0.5, %v2776_v41 }
0x1713   :  { %v1373_v58 = vadd.f32 0.5, %v1372_v57 }
0x1715   :  { %v1375_v62 = vmul.f32 %v1373_v58, %v1285_v27 }
0x1726   :  { %v1027_v54 = vpop.permute.xlu0 %1026 }
0x1727   :  { %1029 = vst.msk [vmem:[#allocation2 + $0x38] sm:$0xff] %vm224_vm2, %v1027_v54  ;;  %1030 = vst.msk [vmem:[#allocation8] sm:$0xff] %vm224_vm2, %v1027_v54 }
0x172e   :  { %v1043_v55 = vld [vmem:[#allocation2 + $0x38] sm:$0xff] }
0x172f   :  { %2479 = vmatmul.mubr.msk.f32.gmra.mrb[16].mxu0 %vm224_vm2, %v1043_v55 }
0x1730   :  { %2511 = vmatprep.mubr.msk.f32.mxu0 %vm2916_vm1, %v2917_v16 }
0x1781   :  { %v1378_v60 = vpop.permute.xlu1 %1377 }
0x1782   :  { %v1380_v61 = vmul.f32 %v1378_v60, %v1373_v58 }
0x1784   :  { %1382 = vrot.lane.b32.xlu1 %v1380_v61, %s2918_s23 }
0x17f6   :  { %v1383_v63 = vpop.permute.xlu1 %1382 }
0x17f7   :  { %v1385_v0 = vadd.f32 %v1383_v63, %v1375_v62 }
0x17f9   :  { %2777 = vtanh.f32 %v1385_v0 }
0x1802   :  { %v3297_v1 = vpop.f32.mrb[16].mxu0 }
0x1803   :  { %v2778_v2 = vpop.eup %2777  ;;  %v3299_v3 = vpop.f32.mrb[17].mxu0 }
0x1804   :  { %1388 = vrot.lane.b32.xlu1 %v2778_v2, %s2918_s23 }
0x1876   :  { %v1389_v4 = vpop.permute.xlu1 %1388 }
0x1877   :  { %v1391_v5 = vmul.f32 %v1389_v4, %v1373_v58 }
0x1879   :  { %1393 = vrot.lane.b32.xlu1 %v1391_v5, %s2919_s5 }
0x18eb   :  { %v1394_v8 = vpop.permute.xlu1 %1393 }
0x18ec   :  { %1396 = vst.msk [vmem:[#allocation2 + $0x8] sm:$0xff] %vm224_vm2, %v1394_v8  ;;  %2512 = vmatmul.mubr.msk.f32.vlgmr.msra.gmra.mrb[18].mxu0 %vm224_vm2, %v1394_v8  ;;  %v1175_v8 = vadd.f32 %v3210_v46, %v3265_v7  ;;  %v2013_v46 = vld [vmem:[%s3493_s9] sm:$0xff] }
0x18ed   :  { %2675 = vmatpush3.bf16.msra.mxu0 %v3225_v59  ;;  %2533 = vmatprep.mubr.msk.f32.mxu0 %vm2916_vm1, %v2917_v16 }
0x18ee   :  { %2676 = vmatprep.subr.bf16.mxu0 %v2915_v10 }
0x18f1   :  { %2678 = vmatpush3.bf16.msra.mxu0 %v3235_v20 }
0x18f2   :  { %2685 = vmatprep.subr.bf16.mxu0 %v2915_v10 }
0x19bf   :  { %v1465_v9 = vpop.f32.mrb[18].mxu0 }
0x19c0   :  { %v1469_v11 = vadd.f32 %v1465_v9, %v1160_v6  ;;  %v2513_v12 = vpop.f32.mrb[19].mxu0 }
0x19c2   :  { %2779 = vtanh.f32 %v1469_v11  ;;  %v1470_v13 = vmul.f32 0.5, %v1469_v11 }
0x19c4   :  { %2781 = vtanh.f32 %v1470_v13 }
0x19cc   :  { %v2780_v15 = vpop.eup %2779 }
0x19cd   :  { %1477 = vrot.lane.b32.xlu0 %v2780_v15, %s2918_s23 }
0x19ce   :  { %v2782_v14 = vpop.eup %2781 }
0x19cf   :  { %v1472_v22 = vmul.f32 0.5, %v2782_v14 }
0x19d1   :  { %v1473_v23 = vadd.f32 0.5, %v1472_v22 }
0x19d3   :  { %v1475_v19 = vmul.f32 %v1473_v23, %v1385_v0 }
0x1a3f   :  { %v1478_v18 = vpop.permute.xlu0 %1477 }
0x1a40   :  { %v1480_v17 = vmul.f32 %v1478_v18, %v1473_v23  ;;  %v2014_v18 = vld [vmem:[%s3493_s9 + $0x8] sm:$0xff] }
0x1a42   :  { %1482 = vrot.lane.b32.xlu1 %v1480_v17, %s2918_s23  ;;  %v2697_v17 = vpack.c.bf16 %v2014_v18, %v2013_v46 }
0x1ab4   :  { %v1483_v21 = vpop.permute.xlu1 %1482 }
0x1ab5   :  { %v1485_v25 = vadd.f32 %v1483_v21, %v1475_v19 }
0x1ab7   :  { %2783 = vtanh.f32 %v1485_v25 }
0x1ac1   :  { %v2784_v45 = vpop.eup %2783 }
0x1ac2   :  { %1488 = vrot.lane.b32.xlu0 %v2784_v45, %s2918_s23  ;;  %v2015_v45 = vld [vmem:[%s3493_s9 + $0x10] sm:$0xff] }
0x1b34   :  { %v1489_v26 = vpop.permute.xlu0 %1488 }
0x1b35   :  { %v1491_v27 = vmul.f32 %v1489_v26, %v1473_v23  ;;  %v2016_v26 = vld [vmem:[%s3493_s9 + $0x18] sm:$0xff] }
0x1b37   :  { %1493 = vrot.lane.b32.xlu1 %v1491_v27, %s2919_s5  ;;  %v2701_v27 = vpack.c.bf16 %v2016_v26, %v2015_v45 }
0x1ba9   :  { %v1494_v28 = vpop.permute.xlu1 %1493 }
0x1baa   :  { %1496 = vst.msk [vmem:[#allocation2 + $0x10] sm:$0xff] %vm224_vm2, %v1494_v28  ;;  %2523 = vmatmul.mubr.msk.f32.vlgmr.msra.gmra.mrb[18].mxu1 %vm224_vm2, %v1494_v28 }
0x1bab   :  { %2681 = vmatpush3.bf16.msra.mxu1 %v3225_v59  ;;  %2544 = vmatprep.mubr.msk.f32.mxu1 %vm2916_vm1, %v2917_v16 }
0x1bac   :  { %2682 = vmatprep.subr.bf16.mxu1 %v2915_v10 }
0x1baf   :  { %2684 = vmatpush3.bf16.msra.mxu1 %v3235_v20 }
0x1bb0   :  { %2691 = vmatprep.subr.bf16.mxu1 %v2915_v10 }
0x1c7d   :  { %v1565_v30 = vpop.f32.mrb[18].mxu1 }
0x1c7e   :  { %v1569_v31 = vadd.f32 %v1565_v30, %v1165_v29  ;;  %v2524_v32 = vpop.f32.mrb[19].mxu1  ;;  %v2005_v29 = vld [vmem:[#allocation2] sm:$0xff]  ;;  %v2006_v30 = vld [vmem:[#allocation2 + $0x8] sm:$0xff] }
0x1c80   :  { %2785 = vtanh.f32 %v1569_v31  ;;  %v1570_v34 = vmul.f32 0.5, %v1569_v31  ;;  %v2007_v31 = vld [vmem:[#allocation2 + $0x10] sm:$0xff] }
0x1c82   :  { %2787 = vtanh.f32 %v1570_v34 }
0x1c8a   :  { %v2786_v33 = vpop.eup %2785 }
0x1c8b   :  { %1577 = vrot.lane.b32.xlu0 %v2786_v33, %s2918_s23 }
0x1c8c   :  { %v2788_v35 = vpop.eup %2787 }
0x1c8d   :  { %v1572_v36 = vmul.f32 0.5, %v2788_v35  ;;  %v1180_v35 = vadd.f32 %v3265_v7, %v3299_v3 }
0x1c8f   :  { %v1573_v37 = vadd.f32 0.5, %v1572_v36 }
0x1c91   :  { %v1575_v40 = vmul.f32 %v1573_v37, %v1485_v25 }
0x1cfd   :  { %v1578_v38 = vpop.permute.xlu0 %1577 }
0x1cfe   :  { %v1580_v39 = vmul.f32 %v1578_v38, %v1573_v37 }
0x1d00   :  { %1582 = vrot.lane.b32.xlu1 %v1580_v39, %s2918_s23  ;;  %v3385_v39 = vld [vmem:[%s3494_s10] ss:$0 sm:$0xff] }
0x1d72   :  { %v1583_v44 = vpop.permute.xlu1 %1582 }
0x1d73   :  { %v1585_v48 = vadd.f32 %v1583_v44, %v1575_v40 }
0x1d75   :  { %2789 = vtanh.f32 %v1585_v48 }
0x1d7f   :  { %v2790_v43 = vpop.eup %2789 }
0x1d80   :  { %1588 = vrot.lane.b32.xlu0 %v2790_v43, %s2918_s23 }
0x1df2   :  { %v1589_v24 = vpop.permute.xlu0 %1588 }
0x1df3   :  { %v1591_v49 = vmul.f32 %v1589_v24, %v1573_v37 }
0x1df5   :  { %1593 = vrot.lane.b32.xlu1 %v1591_v49, %s2919_s5 }
0x1e67   :  { %v1594_v50 = vpop.permute.xlu1 %1593 }
0x1e68   :  { %1596 = vst.msk [vmem:[#allocation2 + $0x18] sm:$0xff] %vm224_vm2, %v1594_v50  ;;  %2534 = vmatmul.mubr.msk.f32.vlgmr.msra.gmra.mrb[20].mxu0 %vm224_vm2, %v1594_v50 }
0x1e69   :  { %2687 = vmatpush3.bf16.msra.mxu0 %v3225_v59  ;;  %2555 = vmatprep.mubr.msk.f32.mxu0 %vm2916_vm1, %v2917_v16 }
0x1e6a   :  { %2688 = vmatprep.subr.bf16.mxu0 %v2915_v10 }
0x1e6d   :  { %2690 = vmatpush3.bf16.msra.mxu0 %v3235_v20 }
0x1e6e   :  { %2698 = vmatprep.subr.bf16.mxu0 %v2697_v17 }
0x1e6f   :  { %v2008_v32 = vld [vmem:[#allocation2 + $0x18] sm:$0xff] }
0x1f3b   :  { %v1665_v52 = vpop.f32.mrb[20].mxu0 }
0x1f3c   :  { %v1669_v53 = vadd.f32 %v1665_v52, %v1170_v51  ;;  %v2535_v54 = vpop.f32.mrb[21].mxu0 }
0x1f3e   :  { %2791 = vtanh.f32 %v1669_v53  ;;  %v1670_v56 = vmul.f32 0.5, %v1669_v53 }
0x1f40   :  { %2793 = vtanh.f32 %v1670_v56 }
0x1f48   :  { %v2792_v55 = vpop.eup %2791 }
0x1f49   :  { %1677 = vrot.lane.b32.xlu0 %v2792_v55, %s2918_s23 }
0x1f4a   :  { %v2794_v41 = vpop.eup %2793 }
0x1f4b   :  { %v1672_v57 = vmul.f32 0.5, %v2794_v41 }
0x1f4d   :  { %v1673_v58 = vadd.f32 0.5, %v1672_v57 }
0x1f4f   :  { %v1675_v62 = vmul.f32 %v1673_v58, %v1585_v48 }
0x1fbb   :  { %v1678_v60 = vpop.permute.xlu0 %1677 }
0x1fbc   :  { %v1680_v61 = vmul.f32 %v1678_v60, %v1673_v58 }
0x1fbe   :  { %1682 = vrot.lane.b32.xlu1 %v1680_v61, %s2918_s23 }
0x2030   :  { %v1683_v63 = vpop.permute.xlu1 %1682 }
0x2031   :  { %v1685_v0 = vadd.f32 %v1683_v63, %v1675_v62 }
0x2033   :  { %2795 = vtanh.f32 %v1685_v0 }
0x203d   :  { %v2796_v47 = vpop.eup %2795 }
0x203e   :  { %1688 = vrot.lane.b32.xlu0 %v2796_v47, %s2918_s23 }
0x20b0   :  { %v1689_v2 = vpop.permute.xlu0 %1688 }
0x20b1   :  { %v1691_v4 = vmul.f32 %v1689_v2, %v1673_v58 }
0x20b3   :  { %1693 = vrot.lane.b32.xlu1 %v1691_v4, %s2919_s5 }
0x2125   :  { %v1694_v5 = vpop.permute.xlu1 %1693 }
0x2126   :  { %1696 = vst.msk [vmem:[#allocation2 + $0x20] sm:$0xff] %vm224_vm2, %v1694_v5  ;;  %2545 = vmatmul.mubr.msk.f32.vlgmr.msra.gmra.mrb[20].mxu1 %vm224_vm2, %v1694_v5 }
0x2127   :  { %2693 = vmatpush3.bf16.msra.mxu1 %v3225_v59  ;;  %2566 = vmatprep.mubr.msk.f32.mxu1 %vm2916_vm1, %v2917_v16 }
0x2128   :  { %2694 = vmatprep.subr.bf16.mxu1 %v2915_v10 }
0x212b   :  { %2696 = vmatpush3.bf16.msra.mxu1 %v3235_v20 }
0x212d   :  { %v2009_v33 = vld [vmem:[#allocation2 + $0x20] sm:$0xff] }
0x21f9   :  { %v1765_v6 = vpop.f32.mrb[20].mxu1 }
0x21fa   :  { %v1769_v9 = vadd.f32 %v1765_v6, %v1175_v8  ;;  %v2546_v11 = vpop.f32.mrb[21].mxu1  ;;  %v1185_v6 = vadd.f32 %v3297_v1, %v3265_v7 }
0x21fc   :  { %2797 = vtanh.f32 %v1769_v9  ;;  %v1770_v15 = vmul.f32 0.5, %v1769_v9 }
0x21fe   :  { %2799 = vtanh.f32 %v1770_v15 }
0x2206   :  { %v2798_v12 = vpop.eup %2797 }
0x2207   :  { %1777 = vrot.lane.b32.xlu0 %v2798_v12, %s2918_s23 }
0x2208   :  { %v2800_v59 = vpop.eup %2799 }
0x2209   :  { %v1772_v13 = vmul.f32 0.5, %v2800_v59 }
0x220b   :  { %v1773_v14 = vadd.f32 0.5, %v1772_v13 }
0x220d   :  { %v1775_v10 = vmul.f32 %v1773_v14, %v1685_v0 }
0x2279   :  { %v1778_v16 = vpop.permute.xlu0 %1777 }
0x227a   :  { %v1780_v22 = vmul.f32 %v1778_v16, %v1773_v14 }
0x227c   :  { %1782 = vrot.lane.b32.xlu1 %v1780_v22, %s2918_s23 }
0x22ee   :  { %v1783_v20 = vpop.permute.xlu1 %1782 }
0x22ef   :  { %v3355_v23 = vadd.f32 %v1783_v20, %v1775_v10 }
0x22f1   :  { %2801 = vtanh.f32 %v3355_v23 }
0x22fb   :  { %v2802_v19 = vpop.eup %2801 }
0x22fc   :  { %1788 = vrot.lane.b32.xlu0 %v2802_v19, %s2918_s23 }
0x236e   :  { %v1789_v21 = vpop.permute.xlu0 %1788 }
0x236f   :  { %v1791_v25 = vmul.f32 %v1789_v21, %v1773_v14 }
0x2371   :  { %1793 = vrot.lane.b32.xlu1 %v1791_v25, %s2919_s5 }
0x23e3   :  { %v1794_v28 = vpop.permute.xlu1 %1793 }
0x23e4   :  { %1796 = vst.msk [vmem:[#allocation2 + $0x28] sm:$0xff] %vm224_vm2, %v1794_v28  ;;  %2556 = vmatmul.mubr.msk.f32.vlgmr.msra.gmra.mrb[22].mxu0 %vm224_vm2, %v1794_v28 }
0x23e5   :  { %2700 = vmatpush3.bf16.msra.mxu0 %v2697_v17  ;;  %2577 = vmatprep.mubr.msk.f32.mxu0 %vm224_vm2, %v2005_v29 }
0x23e6   :  { %2702 = vmatprep.subr.bf16.mxu0 %v2701_v27 }
0x23e9   :  { %2704 = vmatpush3.bf16.msra.mxu0 %v2701_v27 }
0x23eb   :  { %v2010_v34 = vld [vmem:[#allocation2 + $0x28] sm:$0xff] }
0x23ec   :  { %2578 = vmatmul.mubr.msk.f32.vlgmr.msra.gmra.mrb[24].mxu0 %vm224_vm2, %v2006_v30 }
0x23ed   :  { %2580 = vmatprep.mubr.msk.f32.mxu0 %vm224_vm2, %v2007_v31 }
0x23f0   :  { %2581 = vmatmul.mubr.msk.f32.gmra.mrb[26].mxu0 %vm224_vm2, %v2008_v32 }
0x23f1   :  { %2583 = vmatprep.mubr.msk.f32.mxu0 %vm224_vm2, %v2009_v33 }
0x23f4   :  { %2584 = vmatmul.mubr.msk.f32.gmra.mrb[28].mxu0 %vm224_vm2, %v2010_v34 }
0x24b7   :  { %v1865_v36 = vpop.f32.mrb[22].mxu0 }
0x24b8   :  { %v1869_v37 = vadd.f32 %v1865_v36, %v1180_v35  ;;  %v2557_v38 = vpop.f32.mrb[23].mxu0 }
0x24ba   :  { %2803 = vtanh.f32 %v1869_v37  ;;  %v1870_v56 = vmul.f32 0.5, %v1869_v37 }
0x24bc   :  { %2805 = vtanh.f32 %v1870_v56 }
0x24bf   :  { %v2579_v40 = vpop.f32.mrb[24].mxu0 }
0x24c0   :  { %v2120_v44 = vadd.f32 %v2579_v40, %v3385_v39  ;;  %v2114_v48 = vpop.f32.mrb[25].mxu0 }
0x24c1   :  { %v2115_v43 = vadd.f32 %v3385_v39, %v2114_v48 }
0x24c2   :  { %2154 = vst.msk [vmem:[%s3495_s11 + $0x8] sm:$0xff] %vm92_vm0, %v2120_v44 }
0x24c3   :  { %2153 = vst.msk [vmem:[%s3495_s11] sm:$0xff] %vm92_vm0, %v2115_v43  ;;  %v2582_v3 = vpop.f32.mrb[26].mxu0 }
0x24c4   :  { %v2804_v24 = vpop.eup %2803  ;;  %v2130_v49 = vadd.f32 %v2582_v3, %v3385_v39  ;;  %v2124_v50 = vpop.f32.mrb[27].mxu0 }
0x24c5   :  { %v2125_v51 = vadd.f32 %v3385_v39, %v2124_v50  ;;  %1877 = vrot.lane.b32.xlu0 %v2804_v24, %s2918_s23 }
0x24c6   :  { %2156 = vst.msk [vmem:[%s3495_s11 + $0x18] sm:$0xff] %vm92_vm0, %v2130_v49  ;;  %v2806_v41 = vpop.eup %2805 }
0x24c7   :  { %2155 = vst.msk [vmem:[%s3495_s11 + $0x10] sm:$0xff] %vm92_vm0, %v2125_v51  ;;  %v2585_v52 = vpop.f32.mrb[28].mxu0  ;;  %v1872_v57 = vmul.f32 0.5, %v2806_v41 }
0x24c8   :  { %v2140_v53 = vadd.f32 %v2585_v52, %v3385_v39  ;;  %v2134_v54 = vpop.f32.mrb[29].mxu0 }
0x24c9   :  { %v2135_v55 = vadd.f32 %v3385_v39, %v2134_v54  ;;  %v1873_v58 = vadd.f32 0.5, %v1872_v57 }
0x24ca   :  { %2158 = vst.msk [vmem:[%s3495_s11 + $0x28] sm:$0xff] %vm92_vm0, %v2140_v53 }
0x24cb   :  { %2157 = vst.msk [vmem:[%s3495_s11 + $0x20] sm:$0xff] %vm92_vm0, %v2135_v55  ;;  %v1875_v62 = vmul.f32 %v1873_v58, %v3355_v23 }
0x2537   :  { %v1878_v60 = vpop.permute.xlu0 %1877 }
0x2538   :  { %v1880_v61 = vmul.f32 %v1878_v60, %v1873_v58 }
0x253a   :  { %1882 = vrot.lane.b32.xlu1 %v1880_v61, %s2918_s23 }
0x25ac   :  { %v1883_v63 = vpop.permute.xlu1 %1882 }
0x25ad   :  { %v1885_v0 = vadd.f32 %v1883_v63, %v1875_v62 }
0x25af   :  { %2807 = vtanh.f32 %v1885_v0 }
0x25b9   :  { %v2808_v47 = vpop.eup %2807 }
0x25ba   :  { %1888 = vrot.lane.b32.xlu0 %v2808_v47, %s2918_s23 }
0x262c   :  { %v1889_v2 = vpop.permute.xlu0 %1888 }
0x262d   :  { %v1891_v4 = vmul.f32 %v1889_v2, %v1873_v58 }
0x262f   :  { %1893 = vrot.lane.b32.xlu1 %v1891_v4, %s2919_s5 }
0x26a1   :  { %v1894_v5 = vpop.permute.xlu1 %1893 }
0x26a2   :  { %1896 = vst.msk [vmem:[#allocation2 + $0x30] sm:$0xff] %vm224_vm2, %v1894_v5  ;;  %2567 = vmatmul.mubr.msk.f32.vlgmr.msra.gmra.mrb[22].mxu1 %vm224_vm2, %v1894_v5 }
0x26a9   :  { %v2011_v8 = vld [vmem:[#allocation2 + $0x30] sm:$0xff] }
0x26aa   :  { %2586 = vmatprep.mubr.msk.f32.mxu0 %vm224_vm2, %v2011_v8 }
0x2775   :  { %v1965_v9 = vpop.f32.mrb[22].mxu1 }
0x2776   :  { %v1969_v11 = vadd.f32 %v1965_v9, %v1185_v6  ;;  %v2568_v12 = vpop.f32.mrb[23].mxu1 }
0x2778   :  { %2809 = vtanh.f32 %v1969_v11  ;;  %v1970_v59 = vmul.f32 0.5, %v1969_v11 }
0x277a   :  { %2811 = vtanh.f32 %v1970_v59 }
0x2782   :  { %v2810_v15 = vpop.eup %2809 }
0x2783   :  { %1977 = vrot.lane.b32.xlu0 %v2810_v15, %s2918_s23 }
0x2784   :  { %v2812_v13 = vpop.eup %2811 }
0x2785   :  { %v1972_v14 = vmul.f32 0.5, %v2812_v13 }
0x2787   :  { %v1973_v16 = vadd.f32 0.5, %v1972_v14 }
0x2789   :  { %v1975_v20 = vmul.f32 %v1973_v16, %v1885_v0 }
0x27f5   :  { %v1978_v22 = vpop.permute.xlu0 %1977 }
0x27f6   :  { %v1980_v10 = vmul.f32 %v1978_v22, %v1973_v16 }
0x27f8   :  { %1982 = vrot.lane.b32.xlu1 %v1980_v10, %s2918_s23 }
0x286a   :  { %v1983_v23 = vpop.permute.xlu1 %1982 }
0x286b   :  { %v1985_v46 = vadd.f32 %v1983_v23, %v1975_v20 }
0x286d   :  { %2813 = vtanh.f32 %v1985_v46 }
0x2877   :  { %v2814_v7 = vpop.eup %2813 }
0x2878   :  { %1988 = vrot.lane.b32.xlu0 %v2814_v7, %s2918_s23  ;;  %s2921_s23 = smov [#allocation8]  }
0x2879   :  { %s2168_s27 = sshll.u32 %s2921_s23, 4  ;;  %s2169_s27 = int_to_ptr.vmem [resolvable:$true] %s2168_s27 }
0x287a   :  { %p2864_p3 = scmp.lt.s32.totalorder %s2169_s27, %s2169_s27 }
0x287c   :  { %1032 = vrot.lane.b32.xlu0 %v3281_v42, %s2920_s1 }
0x28ea   :  { %v1989_v1 = vpop.permute.xlu0 %1988 }
0x28eb   :  { %v1991_v18 = vmul.f32 %v1989_v1, %v1973_v16 }
0x28ed   :  { %1993 = vrot.lane.b32.xlu1 %v1991_v18, %s2919_s5  ;;  %s2859_s5 = scalar_lea.vmem %s2169_s27, 256 }
0x28ee   :  { %v1033_v17 = vpop.permute.xlu0 %1032  ;;  %p2860_p2 = scmp.ne.s32.totalorder %s2169_s27, %s2859_s5  ;;  %p2865_p4 = scmp.lt.s32.totalorder %s2859_s5, %s2859_s5 }
0x28ef   :  { %1035 = vst.msk [vmem:[#allocation9] sm:$0xff] %vm224_vm2, %v1033_v17 }
0x28f0   :  { %p2866_p5 = por %p2865_p4, %p2864_p3 }
0x28f1   :  { %2000 = vrot.lane.b32.xlu1 %v1985_v46, %s2920_s1 }
0x28f2   :  { %p2867_p6 = pnand %p2866_p5, %p2860_p2 }
0x295f   :  { %v1994_v19 = vpop.permute.xlu1 %1993 }
0x2960   :  { %1996 = vst.msk [vmem:[#allocation2 + $0x38] sm:$0xff] %vm224_vm2, %v1994_v19  ;;  %1998 = vst.msk [vmem:[#allocation8 + $0x8] sm:$0xff] %vm224_vm2, %v1994_v19 }
0x2963   :  { %v2001_v21 = vpop.permute.xlu1 %2000 }
0x2964   :  { %2004 = vst.msk [vmem:[#allocation9 + $0x8] sm:$0xff] %vm224_vm2, %v2001_v21 }
0x2967   :  { %v2012_v25 = vld [vmem:[#allocation2 + $0x38] sm:$0xff] }
0x2968   :  { %2587 = vmatmul.mubr.msk.f32.gmra.mrb[30].mxu0 %vm224_vm2, %v2012_v25 }
0x2969   :  { %2870 = shalt.err (!%p2867_p6)
}
0x296a   :  { %s2871_s30 = scalar_lea.hbm %s3496_s12, 256 }
0x296b   :  { %p2872_p7 = scmp.ne.s32.totalorder %s3496_s12, %s2871_s30  ;;  %p2875_p8 = scmp.lt.u32.totalorder %s2871_s30, %s3496_s12 }
0x296d   :  { %p2877_p9 = pnand %p2875_p8, %p2872_p7 }
0x296f   :  { %2880 = shalt.err (!%p2877_p9)
}
0x2970   :  { %2174 = dma.vmem_to_hbm [thread:$0]  %s2169_s27, 256, %s3496_s12, [#allocation5], %s2912_s18, %s2912_s18, %s2913_s19  }
0x2971   :  { %s2881_s6 = scalar_lea.vmem %s3437_s28, 256  ;;  %p2886_p11 = scmp.lt.s32.totalorder %s3437_s28, %s3437_s28 }
0x2972   :  { %p2882_p10 = scmp.ne.s32.totalorder %s3437_s28, %s2881_s6  ;;  %p2887_p12 = scmp.lt.s32.totalorder %s2881_s6, %s2881_s6 }
0x2974   :  { %p2888_p13 = por %p2887_p12, %p2886_p11 }
0x2976   :  { %p2889_p0 = pnand %p2888_p13, %p2882_p10 }
0x2978   :  { %2892 = shalt.err (!%p2889_p0)
}
0x2979   :  { %s2893_s10 = scalar_lea.hbm %s3497_s13, 256 }
0x297a   :  { %p2894_p1 = scmp.ne.s32.totalorder %s3497_s13, %s2893_s10  ;;  %p2897_p2 = scmp.lt.u32.totalorder %s2893_s10, %s3497_s13 }
0x297c   :  { %p2899_p3 = pnand %p2897_p2, %p2894_p1 }
0x297e   :  { %2902 = shalt.err (!%p2899_p3)
}
0x297f   :  { %2186 = dma.vmem_to_hbm [thread:$0]  %s3437_s28, 256, %s3497_s13, [#allocation10], %s2912_s18, %s2912_s18, %s2913_s19  }
0x2a3b   :  { %v2588_v42 = vpop.f32.mrb[30].mxu0 }
0x2a3c   :  { %v2150_v45 = vadd.f32 %v2588_v42, %v3385_v39  ;;  %v2144_v26 = vpop.f32.mrb[31].mxu0 }
0x2a3d   :  { %v2145_v27 = vadd.f32 %v3385_v39, %v2144_v26 }
0x2a3e   :  { %2160 = vst.msk [vmem:[%s3495_s11 + $0x38] sm:$0xff] %vm92_vm0, %v2150_v45 }
0x2a3f   :  { %2159 = vst.msk [vmem:[%s3495_s11 + $0x30] sm:$0xff] %vm92_vm0, %v2145_v27 }
0x2a40   :  { %2907 = dma.done.wait [#allocation5], 256  }
0x2a41   :  { %2908 = vsyncadd [#allocation5], 4294967040 }
0x2a42   :  { %2909 = dma.done.wait [#allocation10], 256  }
0x2a43   :  { %2910 = vsyncadd [#allocation10], 4294967040 }
0x2a44   :  { %2195 = vsyncpa [#allocation4], 1 }
0x2a45   :  { %2196 = vsyncpa [#allocation7], 1 }
0x2a46   :  { %2197 = vsyncpa [#allocation5], 1 }
0x2a47   :  { %2198 = vsyncpa [#allocation10], 1 }

</bundles_post_ra>
